<compile_context>
chip_gen: v6e
topology: v6e:2x2x1
jax: 0.10.0
libtpu: 0.0.40
codegen_flags: <defaults>
</compile_context>

<pallas_src>
import math
import jax
import jax.numpy as jnp
from jax.experimental import pallas as pl
from jax.experimental.pallas import tpu as pltpu

# ---- small, TPU-friendly config consistent with ALiBiModelArgs semantics ----
DIM = 128          # args.dim
N_HEADS = 4        # args.n_heads
HEAD_DIM = DIM // N_HEADS
N_LAYERS = 2       # args.n_layers
VOCAB = 256        # args.vocab_size
HIDDEN = DIM       # FeedForward(hidden_dim=args.dim, multiple_of=1, mult=None)
EPS = 1e-5         # args.norm_eps
BATCH = 2
SEQ = 8


# ----------------------------- kernel helpers -------------------------------
def _rmsnorm(x, w):
    # x: (rows, DIM) f32, w: (1, DIM) f32 ; keep mean-square + eps in f32
    ms = jnp.mean(x * x, axis=-1, keepdims=True)
    return x * jax.lax.rsqrt(ms + EPS) * w


# --------------------------- fused forward kernel ---------------------------
def fused_forward_kernel(x_ref, mask_ref, anw_ref, fnw_ref, wqkv_ref, wo_ref,
                         w13_ref, w2_ref, fnorm_ref, wout_ref, o_ref):
    x = x_ref[...]                                   # (BS, D) f32
    scale = 1.0 / math.sqrt(HEAD_DIM)

    for l in range(N_LAYERS):                        # static unroll over layers
        # ---------------- attention ----------------
        xn = _rmsnorm(x, anw_ref[l]).astype(jnp.bfloat16)
        qkv = jnp.dot(xn, wqkv_ref[l],
                      preferred_element_type=jnp.float32)       # (BS, 3D) f32
        wo_l = wo_ref[l]                                         # (D, D) bf16
        attn = x                                                 # residual carry
        for hi in range(N_HEADS):                    # static unroll over heads
            lo = hi * HEAD_DIM
            qh = qkv[:, lo:lo + HEAD_DIM].astype(jnp.bfloat16)
            kh = qkv[:, DIM + lo:DIM + lo + HEAD_DIM].astype(jnp.bfloat16)
            vh = qkv[:, 2 * DIM + lo:2 * DIM + lo + HEAD_DIM].astype(jnp.bfloat16)
            sc = jnp.einsum('qd,kd->qk', qh, kh,
                            preferred_element_type=jnp.float32) * scale
            sc = sc + mask_ref[hi]                   # causal + ALiBi + batch-block mask
            m = jnp.max(sc, axis=-1, keepdims=True)
            p = jnp.exp(sc - m)
            p = p * pl.reciprocal(jnp.sum(p, axis=-1, keepdims=True), approx=True)
            oh = jnp.dot(p.astype(jnp.bfloat16), vh,
                         preferred_element_type=jnp.float32)     # (BS, hd)
            # fold wo into per-head row slices: sum_h oh @ wo[h*hd:(h+1)*hd, :]
            attn = attn + jnp.dot(oh.astype(jnp.bfloat16),
                                  wo_l[lo:lo + HEAD_DIM, :],
                                  preferred_element_type=jnp.float32)
        h = attn

        # ------------- feed-forward (SwiGLU) -------------
        hn = _rmsnorm(h, fnw_ref[l]).astype(jnp.bfloat16)
        ab = jnp.dot(hn, w13_ref[l],
                     preferred_element_type=jnp.float32)         # (BS, 2*HIDDEN)
        a = ab[:, :HIDDEN]
        b = ab[:, HIDDEN:]
        g = (a * jax.nn.sigmoid(a)) * b                          # f32 elementwise
        x = h + jnp.dot(g.astype(jnp.bfloat16), w2_ref[l],
                        preferred_element_type=jnp.float32)

    # ------------- final norm + lm head + argmax -------------
    xn = _rmsnorm(x, fnorm_ref[...]).astype(jnp.bfloat16)
    logits = jnp.dot(xn, wout_ref[...],
                     preferred_element_type=jnp.float32)         # (BS, V)
    maxv = jnp.max(logits, axis=-1, keepdims=True)
    iota = jax.lax.broadcasted_iota(jnp.int32, logits.shape, 1)
    idx = jnp.min(jnp.where(logits == maxv, iota, VOCAB),
                  axis=-1, keepdims=True)                        # first argmax
    o_ref[...] = idx.astype(jnp.int32)


# ------------------------------ glue (plain JAX) ----------------------------
def get_slopes_power_of_2(n):
    start = 2 ** (-2 ** (-(math.log2(n) - 3)))
    return [start * start ** i for i in range(n)]


def get_slopes(n):
    if math.log2(n).is_integer():
        return get_slopes_power_of_2(n)
    cp = 2 ** math.floor(math.log2(n))
    return get_slopes_power_of_2(cp) + get_slopes(2 * cp)[0::2][:n - cp]


def build_mask(B, S, slopes):
    """(H, B*S, B*S) mask: causal + ALiBi inside each batch block, -inf across
    batches (lets attention run on the flattened (B*S, D) activation slab)."""
    pos = jnp.arange(S, dtype=jnp.float32)
    rel = pos[None, :] - pos[:, None]                            # k - q, (S, S)
    causal = jnp.where(rel > 0, -jnp.inf, 0.0).astype(jnp.float32)
    per_head = causal[None] + rel[None] * slopes[:, None, None]  # (H, S, S)
    full = jnp.tile(per_head, (1, B, B))                         # (H, BS, BS)
    bidx = jnp.arange(B * S) // S
    same = bidx[:, None] == bidx[None, :]
    return jnp.where(same[None], full, -jnp.inf)


def init_params(key):
    def dense_t(k, in_f, out_f):
        # pre-transposed (in, out); bf16 so the MXU gets native-rate operands
        return (jax.random.normal(k, (in_f, out_f), jnp.float32) * 0.02
                ).astype(jnp.bfloat16)

    keys = jax.random.split(key, 2 + N_LAYERS)
    params = {
        "tok_emb": jax.random.normal(keys[0], (VOCAB, DIM), jnp.float32) * 0.02,
        "out_w_t": dense_t(keys[1], DIM, VOCAB),
        "final_norm_w": jnp.ones((1, DIM), jnp.float32),
        "slopes": jnp.array(get_slopes(N_HEADS), jnp.float32),
    }
    wqkv, wo, w13, w2, anw, fnw = [], [], [], [], [], []
    for li in range(N_LAYERS):
        lk = jax.random.split(keys[2 + li], 7)
        wq = dense_t(lk[0], DIM, DIM)
        wk = dense_t(lk[1], DIM, DIM)
        wv = dense_t(lk[2], DIM, DIM)
        wqkv.append(jnp.concatenate([wq, wk, wv], axis=1))       # (D, 3D)
        wo.append(dense_t(lk[3], DIM, DIM))                      # (D, D)
        w1 = dense_t(lk[4], DIM, HIDDEN)
        w3 = dense_t(lk[6], DIM, HIDDEN)
        w13.append(jnp.concatenate([w1, w3], axis=1))            # (D, 2*HIDDEN)
        w2.append(dense_t(lk[5], HIDDEN, DIM))                   # (HIDDEN, D)
        anw.append(jnp.ones((1, DIM), jnp.float32))
        fnw.append(jnp.ones((1, DIM), jnp.float32))
    params["wqkv_t"] = jnp.stack(wqkv)        # (L, D, 3D) bf16
    params["wo_t"] = jnp.stack(wo)            # (L, D, D)  bf16
    params["w13_t"] = jnp.stack(w13)          # (L, D, 2H) bf16
    params["w2_t"] = jnp.stack(w2)            # (L, H, D)  bf16
    params["attn_norm_w"] = jnp.stack(anw)    # (L, 1, D)  f32
    params["ffn_norm_w"] = jnp.stack(fnw)     # (L, 1, D)  f32
    return params


@jax.jit
def alibi_transformer(tokens, params):
    B, S = tokens.shape
    # token embedding gather (nn.Embedding) in plain JAX, flattened to rows
    h = jnp.take(params["tok_emb"], tokens, axis=0).reshape(B * S, DIM)
    mask = build_mask(B, S, params["slopes"])                    # (H, BS, BS)
    out = pl.pallas_call(
        fused_forward_kernel,
        out_shape=jax.ShapeDtypeStruct((B * S, 1), jnp.int32),
        compiler_params=pltpu.CompilerParams(
            vmem_limit_bytes=32 * 1024 * 1024),
    )(h, mask, params["attn_norm_w"], params["ffn_norm_w"],
      params["wqkv_t"], params["wo_t"], params["w13_t"], params["w2_t"],
      params["final_norm_w"], params["out_w_t"])
    # TODO(synk): start_pos>0 incremental decoding / KV-cache growth path not
    # exercised (forward with seq_batch_size=None only hits start_pos=0).
    return out.reshape(B, S)


if __name__ == "__main__":
    key = jax.random.PRNGKey(0)
    pkey, tkey = jax.random.split(key)
    params = init_params(pkey)
    tokens = jax.random.randint(tkey, (BATCH, SEQ), 0, VOCAB, dtype=jnp.int32)
    out = alibi_transformer(tokens, params)
    out = jax.block_until_ready(out)
    assert out.shape == (BATCH, SEQ) and out.dtype == jnp.int32
    print("KERNEL_OK")
</pallas_src>

<mosaic_0001>
module attributes {stable_mosaic.version = 11 : i64} {
  func.func @fused_forward_kernel(%arg0: memref<16x128xf32, #tpu.memory_space<vmem>>, %arg1: memref<4x16x16xf32, #tpu.memory_space<vmem>>, %arg2: memref<2x1x128xf32, #tpu.memory_space<vmem>>, %arg3: memref<2x1x128xf32, #tpu.memory_space<vmem>>, %arg4: memref<2x128x384xbf16, #tpu.memory_space<vmem>>, %arg5: memref<2x128x128xbf16, #tpu.memory_space<vmem>>, %arg6: memref<2x128x256xbf16, #tpu.memory_space<vmem>>, %arg7: memref<2x128x128xbf16, #tpu.memory_space<vmem>>, %arg8: memref<1x128xf32, #tpu.memory_space<vmem>>, %arg9: memref<128x256xbf16, #tpu.memory_space<vmem>>, %arg10: memref<16x1xi32, #tpu.memory_space<vmem>>) attributes {dimension_semantics = [], scalar_prefetch = 0 : i64, scratch_operands = 0 : i64, tpu.core_type = #tpu.core_type<tc>} {
    %c0 = arith.constant 0 : index
    %c0_0 = arith.constant 0 : index
    %0 = vector.load %arg0[%c0, %c0_0] : memref<16x128xf32, #tpu.memory_space<vmem>>, vector<16x128xf32>
    %c0_1 = arith.constant 0 : index
    %c0_2 = arith.constant 0 : index
    %c0_3 = arith.constant 0 : index
    %1 = vector.load %arg2[%c0_1, %c0_2, %c0_3] : memref<2x1x128xf32, #tpu.memory_space<vmem>>, vector<1x1x128xf32>
    %2 = vector.shape_cast %1 : vector<1x1x128xf32> to vector<1x128xf32>
    %3 = arith.mulf %0, %0 : vector<16x128xf32>
    %cst = arith.constant dense<0.000000e+00> : vector<16xf32>
    %4 = vector.multi_reduction <add>, %3, %cst [1] : vector<16x128xf32> to vector<16xf32>
    %5 = vector.shape_cast %4 : vector<16xf32> to vector<16x1xf32>
    %cst_4 = arith.constant 1.280000e+02 : f32
    %6 = vector.broadcast %cst_4 : f32 to vector<16x1xf32>
    %7 = arith.divf %5, %6 : vector<16x1xf32>
    %cst_5 = arith.constant 9.99999974E-6 : f32
    %8 = vector.broadcast %cst_5 : f32 to vector<16x1xf32>
    %9 = arith.addf %7, %8 : vector<16x1xf32>
    %10 = math.rsqrt %9 : vector<16x1xf32>
    %11 = vector.broadcast %10 : vector<16x1xf32> to vector<16x128xf32>
    %12 = arith.mulf %0, %11 : vector<16x128xf32>
    %13 = vector.broadcast %2 : vector<1x128xf32> to vector<16x128xf32>
    %14 = arith.mulf %12, %13 : vector<16x128xf32>
    %15 = arith.truncf %14 : vector<16x128xf32> to vector<16x128xbf16>
    %c0_6 = arith.constant 0 : index
    %c0_7 = arith.constant 0 : index
    %c0_8 = arith.constant 0 : index
    %16 = vector.load %arg4[%c0_6, %c0_7, %c0_8] : memref<2x128x384xbf16, #tpu.memory_space<vmem>>, vector<1x128x384xbf16>
    %17 = vector.shape_cast %16 : vector<1x128x384xbf16> to vector<128x384xbf16>
    %cst_9 = arith.constant dense<0.000000e+00> : vector<16x384xf32>
    %18 = tpu.matmul %15, %17, %cst_9 {dimension_numbers = #tpu.dot_dimension_numbers<[1], [0], [0], [1], [0, 0, 1, 1], [], []>} : vector<16x128xbf16>, vector<128x384xbf16>, vector<16x384xf32> -> vector<16x384xf32>
    %c0_10 = arith.constant 0 : index
    %c0_11 = arith.constant 0 : index
    %c0_12 = arith.constant 0 : index
    %19 = vector.load %arg5[%c0_10, %c0_11, %c0_12] : memref<2x128x128xbf16, #tpu.memory_space<vmem>>, vector<1x128x128xbf16>
    %20 = vector.shape_cast %19 : vector<1x128x128xbf16> to vector<128x128xbf16>
    %21 = vector.extract_strided_slice %18 {offsets = [0, 0], sizes = [16, 32], strides = [1, 1]} : vector<16x384xf32> to vector<16x32xf32>
    %22 = arith.truncf %21 : vector<16x32xf32> to vector<16x32xbf16>
    %23 = vector.extract_strided_slice %18 {offsets = [0, 128], sizes = [16, 32], strides = [1, 1]} : vector<16x384xf32> to vector<16x32xf32>
    %24 = arith.truncf %23 : vector<16x32xf32> to vector<16x32xbf16>
    %25 = vector.extract_strided_slice %18 {offsets = [0, 256], sizes = [16, 32], strides = [1, 1]} : vector<16x384xf32> to vector<16x32xf32>
    %26 = arith.truncf %25 : vector<16x32xf32> to vector<16x32xbf16>
    "tpu.trace_start"() <{level = 10 : i32, message = "qd,kd->qk"}> : () -> ()
    %cst_13 = arith.constant dense<0.000000e+00> : vector<16x16xf32>
    %27 = tpu.matmul %22, %24, %cst_13 {dimension_numbers = #tpu.dot_dimension_numbers<[1], [1], [0], [0], [0, 0, 1, 0], [], []>} : vector<16x32xbf16>, vector<16x32xbf16>, vector<16x16xf32> -> vector<16x16xf32>
    "tpu.trace_stop"() : () -> ()
    %cst_14 = arith.constant 0.176776692 : f32
    %28 = vector.broadcast %cst_14 : f32 to vector<16x16xf32>
    %29 = arith.mulf %27, %28 : vector<16x16xf32>
    %c0_15 = arith.constant 0 : index
    %c0_16 = arith.constant 0 : index
    %c0_17 = arith.constant 0 : index
    %30 = vector.load %arg1[%c0_15, %c0_16, %c0_17] : memref<4x16x16xf32, #tpu.memory_space<vmem>>, vector<1x16x16xf32>
    %31 = vector.shape_cast %30 : vector<1x16x16xf32> to vector<16x16xf32>
    %32 = arith.addf %29, %31 : vector<16x16xf32>
    %cst_18 = arith.constant dense<0xFF800000> : vector<16xf32>
    %33 = vector.multi_reduction <maximumf>, %32, %cst_18 [1] : vector<16x16xf32> to vector<16xf32>
    %34 = vector.shape_cast %33 : vector<16xf32> to vector<16x1xf32>
    %35 = vector.broadcast %34 : vector<16x1xf32> to vector<16x16xf32>
    %36 = arith.subf %32, %35 : vector<16x16xf32>
    %37 = math.exp %36 : vector<16x16xf32>
    %cst_19 = arith.constant dense<0.000000e+00> : vector<16xf32>
    %38 = vector.multi_reduction <add>, %37, %cst_19 [1] : vector<16x16xf32> to vector<16xf32>
    %39 = vector.shape_cast %38 : vector<16xf32> to vector<16x1xf32>
    %40 = tpu.reciprocal %39 {approx = true} : vector<16x1xf32> -> vector<16x1xf32>
    %41 = vector.broadcast %40 : vector<16x1xf32> to vector<16x16xf32>
    %42 = arith.mulf %37, %41 : vector<16x16xf32>
    %43 = arith.truncf %42 : vector<16x16xf32> to vector<16x16xbf16>
    %cst_20 = arith.constant dense<0.000000e+00> : vector<16x32xf32>
    %44 = tpu.matmul %43, %26, %cst_20 {dimension_numbers = #tpu.dot_dimension_numbers<[1], [0], [0], [1], [0, 0, 1, 1], [], []>} : vector<16x16xbf16>, vector<16x32xbf16>, vector<16x32xf32> -> vector<16x32xf32>
    %45 = arith.truncf %44 : vector<16x32xf32> to vector<16x32xbf16>
    %46 = vector.extract_strided_slice %20 {offsets = [0, 0], sizes = [32, 128], strides = [1, 1]} : vector<128x128xbf16> to vector<32x128xbf16>
    %cst_21 = arith.constant dense<0.000000e+00> : vector<16x128xf32>
    %47 = tpu.matmul %45, %46, %cst_21 {dimension_numbers = #tpu.dot_dimension_numbers<[1], [0], [0], [1], [0, 0, 1, 1], [], []>} : vector<16x32xbf16>, vector<32x128xbf16>, vector<16x128xf32> -> vector<16x128xf32>
    %48 = arith.addf %0, %47 : vector<16x128xf32>
    %49 = vector.extract_strided_slice %18 {offsets = [0, 32], sizes = [16, 32], strides = [1, 1]} : vector<16x384xf32> to vector<16x32xf32>
    %50 = arith.truncf %49 : vector<16x32xf32> to vector<16x32xbf16>
    %51 = vector.extract_strided_slice %18 {offsets = [0, 160], sizes = [16, 32], strides = [1, 1]} : vector<16x384xf32> to vector<16x32xf32>
    %52 = arith.truncf %51 : vector<16x32xf32> to vector<16x32xbf16>
    %53 = vector.extract_strided_slice %18 {offsets = [0, 288], sizes = [16, 32], strides = [1, 1]} : vector<16x384xf32> to vector<16x32xf32>
    %54 = arith.truncf %53 : vector<16x32xf32> to vector<16x32xbf16>
    "tpu.trace_start"() <{level = 10 : i32, message = "qd,kd->qk"}> : () -> ()
    %cst_22 = arith.constant dense<0.000000e+00> : vector<16x16xf32>
    %55 = tpu.matmul %50, %52, %cst_22 {dimension_numbers = #tpu.dot_dimension_numbers<[1], [1], [0], [0], [0, 0, 1, 0], [], []>} : vector<16x32xbf16>, vector<16x32xbf16>, vector<16x16xf32> -> vector<16x16xf32>
    "tpu.trace_stop"() : () -> ()
    %cst_23 = arith.constant 0.176776692 : f32
    %56 = vector.broadcast %cst_23 : f32 to vector<16x16xf32>
    %57 = arith.mulf %55, %56 : vector<16x16xf32>
    %c1 = arith.constant 1 : index
    %c0_24 = arith.constant 0 : index
    %c0_25 = arith.constant 0 : index
    %58 = vector.load %arg1[%c1, %c0_24, %c0_25] : memref<4x16x16xf32, #tpu.memory_space<vmem>>, vector<1x16x16xf32>
    %59 = vector.shape_cast %58 : vector<1x16x16xf32> to vector<16x16xf32>
    %60 = arith.addf %57, %59 : vector<16x16xf32>
    %cst_26 = arith.constant dense<0xFF800000> : vector<16xf32>
    %61 = vector.multi_reduction <maximumf>, %60, %cst_26 [1] : vector<16x16xf32> to vector<16xf32>
    %62 = vector.shape_cast %61 : vector<16xf32> to vector<16x1xf32>
    %63 = vector.broadcast %62 : vector<16x1xf32> to vector<16x16xf32>
    %64 = arith.subf %60, %63 : vector<16x16xf32>
    %65 = math.exp %64 : vector<16x16xf32>
    %cst_27 = arith.constant dense<0.000000e+00> : vector<16xf32>
    %66 = vector.multi_reduction <add>, %65, %cst_27 [1] : vector<16x16xf32> to vector<16xf32>
    %67 = vector.shape_cast %66 : vector<16xf32> to vector<16x1xf32>
    %68 = tpu.reciprocal %67 {approx = true} : vector<16x1xf32> -> vector<16x1xf32>
    %69 = vector.broadcast %68 : vector<16x1xf32> to vector<16x16xf32>
    %70 = arith.mulf %65, %69 : vector<16x16xf32>
    %71 = arith.truncf %70 : vector<16x16xf32> to vector<16x16xbf16>
    %cst_28 = arith.constant dense<0.000000e+00> : vector<16x32xf32>
    %72 = tpu.matmul %71, %54, %cst_28 {dimension_numbers = #tpu.dot_dimension_numbers<[1], [0], [0], [1], [0, 0, 1, 1], [], []>} : vector<16x16xbf16>, vector<16x32xbf16>, vector<16x32xf32> -> vector<16x32xf32>
    %73 = arith.truncf %72 : vector<16x32xf32> to vector<16x32xbf16>
    %74 = vector.extract_strided_slice %20 {offsets = [32, 0], sizes = [32, 128], strides = [1, 1]} : vector<128x128xbf16> to vector<32x128xbf16>
    %cst_29 = arith.constant dense<0.000000e+00> : vector<16x128xf32>
    %75 = tpu.matmul %73, %74, %cst_29 {dimension_numbers = #tpu.dot_dimension_numbers<[1], [0], [0], [1], [0, 0, 1, 1], [], []>} : vector<16x32xbf16>, vector<32x128xbf16>, vector<16x128xf32> -> vector<16x128xf32>
    %76 = arith.addf %48, %75 : vector<16x128xf32>
    %77 = vector.extract_strided_slice %18 {offsets = [0, 64], sizes = [16, 32], strides = [1, 1]} : vector<16x384xf32> to vector<16x32xf32>
    %78 = arith.truncf %77 : vector<16x32xf32> to vector<16x32xbf16>
    %79 = vector.extract_strided_slice %18 {offsets = [0, 192], sizes = [16, 32], strides = [1, 1]} : vector<16x384xf32> to vector<16x32xf32>
    %80 = arith.truncf %79 : vector<16x32xf32> to vector<16x32xbf16>
    %81 = vector.extract_strided_slice %18 {offsets = [0, 320], sizes = [16, 32], strides = [1, 1]} : vector<16x384xf32> to vector<16x32xf32>
    %82 = arith.truncf %81 : vector<16x32xf32> to vector<16x32xbf16>
    "tpu.trace_start"() <{level = 10 : i32, message = "qd,kd->qk"}> : () -> ()
    %cst_30 = arith.constant dense<0.000000e+00> : vector<16x16xf32>
    %83 = tpu.matmul %78, %80, %cst_30 {dimension_numbers = #tpu.dot_dimension_numbers<[1], [1], [0], [0], [0, 0, 1, 0], [], []>} : vector<16x32xbf16>, vector<16x32xbf16>, vector<16x16xf32> -> vector<16x16xf32>
    "tpu.trace_stop"() : () -> ()
    %cst_31 = arith.constant 0.176776692 : f32
    %84 = vector.broadcast %cst_31 : f32 to vector<16x16xf32>
    %85 = arith.mulf %83, %84 : vector<16x16xf32>
    %c2 = arith.constant 2 : index
    %c0_32 = arith.constant 0 : index
    %c0_33 = arith.constant 0 : index
    %86 = vector.load %arg1[%c2, %c0_32, %c0_33] : memref<4x16x16xf32, #tpu.memory_space<vmem>>, vector<1x16x16xf32>
    %87 = vector.shape_cast %86 : vector<1x16x16xf32> to vector<16x16xf32>
    %88 = arith.addf %85, %87 : vector<16x16xf32>
    %cst_34 = arith.constant dense<0xFF800000> : vector<16xf32>
    %89 = vector.multi_reduction <maximumf>, %88, %cst_34 [1] : vector<16x16xf32> to vector<16xf32>
    %90 = vector.shape_cast %89 : vector<16xf32> to vector<16x1xf32>
    %91 = vector.broadcast %90 : vector<16x1xf32> to vector<16x16xf32>
    %92 = arith.subf %88, %91 : vector<16x16xf32>
    %93 = math.exp %92 : vector<16x16xf32>
    %cst_35 = arith.constant dense<0.000000e+00> : vector<16xf32>
    %94 = vector.multi_reduction <add>, %93, %cst_35 [1] : vector<16x16xf32> to vector<16xf32>
    %95 = vector.shape_cast %94 : vector<16xf32> to vector<16x1xf32>
    %96 = tpu.reciprocal %95 {approx = true} : vector<16x1xf32> -> vector<16x1xf32>
    %97 = vector.broadcast %96 : vector<16x1xf32> to vector<16x16xf32>
    %98 = arith.mulf %93, %97 : vector<16x16xf32>
    %99 = arith.truncf %98 : vector<16x16xf32> to vector<16x16xbf16>
    %cst_36 = arith.constant dense<0.000000e+00> : vector<16x32xf32>
    %100 = tpu.matmul %99, %82, %cst_36 {dimension_numbers = #tpu.dot_dimension_numbers<[1], [0], [0], [1], [0, 0, 1, 1], [], []>} : vector<16x16xbf16>, vector<16x32xbf16>, vector<16x32xf32> -> vector<16x32xf32>
    %101 = arith.truncf %100 : vector<16x32xf32> to vector<16x32xbf16>
    %102 = vector.extract_strided_slice %20 {offsets = [64, 0], sizes = [32, 128], strides = [1, 1]} : vector<128x128xbf16> to vector<32x128xbf16>
    %cst_37 = arith.constant dense<0.000000e+00> : vector<16x128xf32>
    %103 = tpu.matmul %101, %102, %cst_37 {dimension_numbers = #tpu.dot_dimension_numbers<[1], [0], [0], [1], [0, 0, 1, 1], [], []>} : vector<16x32xbf16>, vector<32x128xbf16>, vector<16x128xf32> -> vector<16x128xf32>
    %104 = arith.addf %76, %103 : vector<16x128xf32>
    %105 = vector.extract_strided_slice %18 {offsets = [0, 96], sizes = [16, 32], strides = [1, 1]} : vector<16x384xf32> to vector<16x32xf32>
    %106 = arith.truncf %105 : vector<16x32xf32> to vector<16x32xbf16>
    %107 = vector.extract_strided_slice %18 {offsets = [0, 224], sizes = [16, 32], strides = [1, 1]} : vector<16x384xf32> to vector<16x32xf32>
    %108 = arith.truncf %107 : vector<16x32xf32> to vector<16x32xbf16>
    %109 = vector.extract_strided_slice %18 {offsets = [0, 352], sizes = [16, 32], strides = [1, 1]} : vector<16x384xf32> to vector<16x32xf32>
    %110 = arith.truncf %109 : vector<16x32xf32> to vector<16x32xbf16>
    "tpu.trace_start"() <{level = 10 : i32, message = "qd,kd->qk"}> : () -> ()
    %cst_38 = arith.constant dense<0.000000e+00> : vector<16x16xf32>
    %111 = tpu.matmul %106, %108, %cst_38 {dimension_numbers = #tpu.dot_dimension_numbers<[1], [1], [0], [0], [0, 0, 1, 0], [], []>} : vector<16x32xbf16>, vector<16x32xbf16>, vector<16x16xf32> -> vector<16x16xf32>
    "tpu.trace_stop"() : () -> ()
    %cst_39 = arith.constant 0.176776692 : f32
    %112 = vector.broadcast %cst_39 : f32 to vector<16x16xf32>
    %113 = arith.mulf %111, %112 : vector<16x16xf32>
    %c3 = arith.constant 3 : index
    %c0_40 = arith.constant 0 : index
    %c0_41 = arith.constant 0 : index
    %114 = vector.load %arg1[%c3, %c0_40, %c0_41] : memref<4x16x16xf32, #tpu.memory_space<vmem>>, vector<1x16x16xf32>
    %115 = vector.shape_cast %114 : vector<1x16x16xf32> to vector<16x16xf32>
    %116 = arith.addf %113, %115 : vector<16x16xf32>
    %cst_42 = arith.constant dense<0xFF800000> : vector<16xf32>
    %117 = vector.multi_reduction <maximumf>, %116, %cst_42 [1] : vector<16x16xf32> to vector<16xf32>
    %118 = vector.shape_cast %117 : vector<16xf32> to vector<16x1xf32>
    %119 = vector.broadcast %118 : vector<16x1xf32> to vector<16x16xf32>
    %120 = arith.subf %116, %119 : vector<16x16xf32>
    %121 = math.exp %120 : vector<16x16xf32>
    %cst_43 = arith.constant dense<0.000000e+00> : vector<16xf32>
    %122 = vector.multi_reduction <add>, %121, %cst_43 [1] : vector<16x16xf32> to vector<16xf32>
    %123 = vector.shape_cast %122 : vector<16xf32> to vector<16x1xf32>
    %124 = tpu.reciprocal %123 {approx = true} : vector<16x1xf32> -> vector<16x1xf32>
    %125 = vector.broadcast %124 : vector<16x1xf32> to vector<16x16xf32>
    %126 = arith.mulf %121, %125 : vector<16x16xf32>
    %127 = arith.truncf %126 : vector<16x16xf32> to vector<16x16xbf16>
    %cst_44 = arith.constant dense<0.000000e+00> : vector<16x32xf32>
    %128 = tpu.matmul %127, %110, %cst_44 {dimension_numbers = #tpu.dot_dimension_numbers<[1], [0], [0], [1], [0, 0, 1, 1], [], []>} : vector<16x16xbf16>, vector<16x32xbf16>, vector<16x32xf32> -> vector<16x32xf32>
    %129 = arith.truncf %128 : vector<16x32xf32> to vector<16x32xbf16>
    %130 = vector.extract_strided_slice %20 {offsets = [96, 0], sizes = [32, 128], strides = [1, 1]} : vector<128x128xbf16> to vector<32x128xbf16>
    %cst_45 = arith.constant dense<0.000000e+00> : vector<16x128xf32>
    %131 = tpu.matmul %129, %130, %cst_45 {dimension_numbers = #tpu.dot_dimension_numbers<[1], [0], [0], [1], [0, 0, 1, 1], [], []>} : vector<16x32xbf16>, vector<32x128xbf16>, vector<16x128xf32> -> vector<16x128xf32>
    %132 = arith.addf %104, %131 : vector<16x128xf32>
    %c0_46 = arith.constant 0 : index
    %c0_47 = arith.constant 0 : index
    %c0_48 = arith.constant 0 : index
    %133 = vector.load %arg3[%c0_46, %c0_47, %c0_48] : memref<2x1x128xf32, #tpu.memory_space<vmem>>, vector<1x1x128xf32>
    %134 = vector.shape_cast %133 : vector<1x1x128xf32> to vector<1x128xf32>
    %135 = arith.mulf %132, %132 : vector<16x128xf32>
    %cst_49 = arith.constant dense<0.000000e+00> : vector<16xf32>
    %136 = vector.multi_reduction <add>, %135, %cst_49 [1] : vector<16x128xf32> to vector<16xf32>
    %137 = vector.shape_cast %136 : vector<16xf32> to vector<16x1xf32>
    %cst_50 = arith.constant 1.280000e+02 : f32
    %138 = vector.broadcast %cst_50 : f32 to vector<16x1xf32>
    %139 = arith.divf %137, %138 : vector<16x1xf32>
    %cst_51 = arith.constant 9.99999974E-6 : f32
    %140 = vector.broadcast %cst_51 : f32 to vector<16x1xf32>
    %141 = arith.addf %139, %140 : vector<16x1xf32>
    %142 = math.rsqrt %141 : vector<16x1xf32>
    %143 = vector.broadcast %142 : vector<16x1xf32> to vector<16x128xf32>
    %144 = arith.mulf %132, %143 : vector<16x128xf32>
    %145 = vector.broadcast %134 : vector<1x128xf32> to vector<16x128xf32>
    %146 = arith.mulf %144, %145 : vector<16x128xf32>
    %147 = arith.truncf %146 : vector<16x128xf32> to vector<16x128xbf16>
    %c0_52 = arith.constant 0 : index
    %c0_53 = arith.constant 0 : index
    %c0_54 = arith.constant 0 : index
    %148 = vector.load %arg6[%c0_52, %c0_53, %c0_54] : memref<2x128x256xbf16, #tpu.memory_space<vmem>>, vector<1x128x256xbf16>
    %149 = vector.shape_cast %148 : vector<1x128x256xbf16> to vector<128x256xbf16>
    %cst_55 = arith.constant dense<0.000000e+00> : vector<16x256xf32>
    %150 = tpu.matmul %147, %149, %cst_55 {dimension_numbers = #tpu.dot_dimension_numbers<[1], [0], [0], [1], [0, 0, 1, 1], [], []>} : vector<16x128xbf16>, vector<128x256xbf16>, vector<16x256xf32> -> vector<16x256xf32>
    %151 = vector.extract_strided_slice %150 {offsets = [0, 0], sizes = [16, 128], strides = [1, 1]} : vector<16x256xf32> to vector<16x128xf32>
    %152 = vector.extract_strided_slice %150 {offsets = [0, 128], sizes = [16, 128], strides = [1, 1]} : vector<16x256xf32> to vector<16x128xf32>
    %153 = arith.negf %151 : vector<16x128xf32>
    %154 = math.exp %153 : vector<16x128xf32>
    %cst_56 = arith.constant 1.000000e+00 : f32
    %155 = vector.broadcast %cst_56 : f32 to vector<16x128xf32>
    %156 = arith.addf %155, %154 : vector<16x128xf32>
    %157 = arith.divf %155, %156 : vector<16x128xf32>
    %158 = arith.mulf %151, %157 : vector<16x128xf32>
    %159 = arith.mulf %158, %152 : vector<16x128xf32>
    %160 = arith.truncf %159 : vector<16x128xf32> to vector<16x128xbf16>
    %c0_57 = arith.constant 0 : index
    %c0_58 = arith.constant 0 : index
    %c0_59 = arith.constant 0 : index
    %161 = vector.load %arg7[%c0_57, %c0_58, %c0_59] : memref<2x128x128xbf16, #tpu.memory_space<vmem>>, vector<1x128x128xbf16>
    %162 = vector.shape_cast %161 : vector<1x128x128xbf16> to vector<128x128xbf16>
    %cst_60 = arith.constant dense<0.000000e+00> : vector<16x128xf32>
    %163 = tpu.matmul %160, %162, %cst_60 {dimension_numbers = #tpu.dot_dimension_numbers<[1], [0], [0], [1], [0, 0, 1, 1], [], []>} : vector<16x128xbf16>, vector<128x128xbf16>, vector<16x128xf32> -> vector<16x128xf32>
    %164 = arith.addf %132, %163 : vector<16x128xf32>
    %c1_61 = arith.constant 1 : index
    %c0_62 = arith.constant 0 : index
    %c0_63 = arith.constant 0 : index
    %165 = vector.load %arg2[%c1_61, %c0_62, %c0_63] : memref<2x1x128xf32, #tpu.memory_space<vmem>>, vector<1x1x128xf32>
    %166 = vector.shape_cast %165 : vector<1x1x128xf32> to vector<1x128xf32>
    %167 = arith.mulf %164, %164 : vector<16x128xf32>
    %cst_64 = arith.constant dense<0.000000e+00> : vector<16xf32>
    %168 = vector.multi_reduction <add>, %167, %cst_64 [1] : vector<16x128xf32> to vector<16xf32>
    %169 = vector.shape_cast %168 : vector<16xf32> to vector<16x1xf32>
    %cst_65 = arith.constant 1.280000e+02 : f32
    %170 = vector.broadcast %cst_65 : f32 to vector<16x1xf32>
    %171 = arith.divf %169, %170 : vector<16x1xf32>
    %cst_66 = arith.constant 9.99999974E-6 : f32
    %172 = vector.broadcast %cst_66 : f32 to vector<16x1xf32>
    %173 = arith.addf %171, %172 : vector<16x1xf32>
    %174 = math.rsqrt %173 : vector<16x1xf32>
    %175 = vector.broadcast %174 : vector<16x1xf32> to vector<16x128xf32>
    %176 = arith.mulf %164, %175 : vector<16x128xf32>
    %177 = vector.broadcast %166 : vector<1x128xf32> to vector<16x128xf32>
    %178 = arith.mulf %176, %177 : vector<16x128xf32>
    %179 = arith.truncf %178 : vector<16x128xf32> to vector<16x128xbf16>
    %c1_67 = arith.constant 1 : index
    %c0_68 = arith.constant 0 : index
    %c0_69 = arith.constant 0 : index
    %180 = vector.load %arg4[%c1_67, %c0_68, %c0_69] : memref<2x128x384xbf16, #tpu.memory_space<vmem>>, vector<1x128x384xbf16>
    %181 = vector.shape_cast %180 : vector<1x128x384xbf16> to vector<128x384xbf16>
    %cst_70 = arith.constant dense<0.000000e+00> : vector<16x384xf32>
    %182 = tpu.matmul %179, %181, %cst_70 {dimension_numbers = #tpu.dot_dimension_numbers<[1], [0], [0], [1], [0, 0, 1, 1], [], []>} : vector<16x128xbf16>, vector<128x384xbf16>, vector<16x384xf32> -> vector<16x384xf32>
    %c1_71 = arith.constant 1 : index
    %c0_72 = arith.constant 0 : index
    %c0_73 = arith.constant 0 : index
    %183 = vector.load %arg5[%c1_71, %c0_72, %c0_73] : memref<2x128x128xbf16, #tpu.memory_space<vmem>>, vector<1x128x128xbf16>
    %184 = vector.shape_cast %183 : vector<1x128x128xbf16> to vector<128x128xbf16>
    %185 = vector.extract_strided_slice %182 {offsets = [0, 0], sizes = [16, 32], strides = [1, 1]} : vector<16x384xf32> to vector<16x32xf32>
    %186 = arith.truncf %185 : vector<16x32xf32> to vector<16x32xbf16>
    %187 = vector.extract_strided_slice %182 {offsets = [0, 128], sizes = [16, 32], strides = [1, 1]} : vector<16x384xf32> to vector<16x32xf32>
    %188 = arith.truncf %187 : vector<16x32xf32> to vector<16x32xbf16>
    %189 = vector.extract_strided_slice %182 {offsets = [0, 256], sizes = [16, 32], strides = [1, 1]} : vector<16x384xf32> to vector<16x32xf32>
    %190 = arith.truncf %189 : vector<16x32xf32> to vector<16x32xbf16>
    "tpu.trace_start"() <{level = 10 : i32, message = "qd,kd->qk"}> : () -> ()
    %cst_74 = arith.constant dense<0.000000e+00> : vector<16x16xf32>
    %191 = tpu.matmul %186, %188, %cst_74 {dimension_numbers = #tpu.dot_dimension_numbers<[1], [1], [0], [0], [0, 0, 1, 0], [], []>} : vector<16x32xbf16>, vector<16x32xbf16>, vector<16x16xf32> -> vector<16x16xf32>
    "tpu.trace_stop"() : () -> ()
    %cst_75 = arith.constant 0.176776692 : f32
    %192 = vector.broadcast %cst_75 : f32 to vector<16x16xf32>
    %193 = arith.mulf %191, %192 : vector<16x16xf32>
    %c0_76 = arith.constant 0 : index
    %c0_77 = arith.constant 0 : index
    %c0_78 = arith.constant 0 : index
    %194 = vector.load %arg1[%c0_76, %c0_77, %c0_78] : memref<4x16x16xf32, #tpu.memory_space<vmem>>, vector<1x16x16xf32>
    %195 = vector.shape_cast %194 : vector<1x16x16xf32> to vector<16x16xf32>
    %196 = arith.addf %193, %195 : vector<16x16xf32>
    %cst_79 = arith.constant dense<0xFF800000> : vector<16xf32>
    %197 = vector.multi_reduction <maximumf>, %196, %cst_79 [1] : vector<16x16xf32> to vector<16xf32>
    %198 = vector.shape_cast %197 : vector<16xf32> to vector<16x1xf32>
    %199 = vector.broadcast %198 : vector<16x1xf32> to vector<16x16xf32>
    %200 = arith.subf %196, %199 : vector<16x16xf32>
    %201 = math.exp %200 : vector<16x16xf32>
    %cst_80 = arith.constant dense<0.000000e+00> : vector<16xf32>
    %202 = vector.multi_reduction <add>, %201, %cst_80 [1] : vector<16x16xf32> to vector<16xf32>
    %203 = vector.shape_cast %202 : vector<16xf32> to vector<16x1xf32>
    %204 = tpu.reciprocal %203 {approx = true} : vector<16x1xf32> -> vector<16x1xf32>
    %205 = vector.broadcast %204 : vector<16x1xf32> to vector<16x16xf32>
    %206 = arith.mulf %201, %205 : vector<16x16xf32>
    %207 = arith.truncf %206 : vector<16x16xf32> to vector<16x16xbf16>
    %cst_81 = arith.constant dense<0.000000e+00> : vector<16x32xf32>
    %208 = tpu.matmul %207, %190, %cst_81 {dimension_numbers = #tpu.dot_dimension_numbers<[1], [0], [0], [1], [0, 0, 1, 1], [], []>} : vector<16x16xbf16>, vector<16x32xbf16>, vector<16x32xf32> -> vector<16x32xf32>
    %209 = arith.truncf %208 : vector<16x32xf32> to vector<16x32xbf16>
    %210 = vector.extract_strided_slice %184 {offsets = [0, 0], sizes = [32, 128], strides = [1, 1]} : vector<128x128xbf16> to vector<32x128xbf16>
    %cst_82 = arith.constant dense<0.000000e+00> : vector<16x128xf32>
    %211 = tpu.matmul %209, %210, %cst_82 {dimension_numbers = #tpu.dot_dimension_numbers<[1], [0], [0], [1], [0, 0, 1, 1], [], []>} : vector<16x32xbf16>, vector<32x128xbf16>, vector<16x128xf32> -> vector<16x128xf32>
    %212 = arith.addf %164, %211 : vector<16x128xf32>
    %213 = vector.extract_strided_slice %182 {offsets = [0, 32], sizes = [16, 32], strides = [1, 1]} : vector<16x384xf32> to vector<16x32xf32>
    %214 = arith.truncf %213 : vector<16x32xf32> to vector<16x32xbf16>
    %215 = vector.extract_strided_slice %182 {offsets = [0, 160], sizes = [16, 32], strides = [1, 1]} : vector<16x384xf32> to vector<16x32xf32>
    %216 = arith.truncf %215 : vector<16x32xf32> to vector<16x32xbf16>
    %217 = vector.extract_strided_slice %182 {offsets = [0, 288], sizes = [16, 32], strides = [1, 1]} : vector<16x384xf32> to vector<16x32xf32>
    %218 = arith.truncf %217 : vector<16x32xf32> to vector<16x32xbf16>
    "tpu.trace_start"() <{level = 10 : i32, message = "qd,kd->qk"}> : () -> ()
    %cst_83 = arith.constant dense<0.000000e+00> : vector<16x16xf32>
    %219 = tpu.matmul %214, %216, %cst_83 {dimension_numbers = #tpu.dot_dimension_numbers<[1], [1], [0], [0], [0, 0, 1, 0], [], []>} : vector<16x32xbf16>, vector<16x32xbf16>, vector<16x16xf32> -> vector<16x16xf32>
    "tpu.trace_stop"() : () -> ()
    %cst_84 = arith.constant 0.176776692 : f32
    %220 = vector.broadcast %cst_84 : f32 to vector<16x16xf32>
    %221 = arith.mulf %219, %220 : vector<16x16xf32>
    %c1_85 = arith.constant 1 : index
    %c0_86 = arith.constant 0 : index
    %c0_87 = arith.constant 0 : index
    %222 = vector.load %arg1[%c1_85, %c0_86, %c0_87] : memref<4x16x16xf32, #tpu.memory_space<vmem>>, vector<1x16x16xf32>
    %223 = vector.shape_cast %222 : vector<1x16x16xf32> to vector<16x16xf32>
    %224 = arith.addf %221, %223 : vector<16x16xf32>
    %cst_88 = arith.constant dense<0xFF800000> : vector<16xf32>
    %225 = vector.multi_reduction <maximumf>, %224, %cst_88 [1] : vector<16x16xf32> to vector<16xf32>
    %226 = vector.shape_cast %225 : vector<16xf32> to vector<16x1xf32>
    %227 = vector.broadcast %226 : vector<16x1xf32> to vector<16x16xf32>
    %228 = arith.subf %224, %227 : vector<16x16xf32>
    %229 = math.exp %228 : vector<16x16xf32>
    %cst_89 = arith.constant dense<0.000000e+00> : vector<16xf32>
    %230 = vector.multi_reduction <add>, %229, %cst_89 [1] : vector<16x16xf32> to vector<16xf32>
    %231 = vector.shape_cast %230 : vector<16xf32> to vector<16x1xf32>
    %232 = tpu.reciprocal %231 {approx = true} : vector<16x1xf32> -> vector<16x1xf32>
    %233 = vector.broadcast %232 : vector<16x1xf32> to vector<16x16xf32>
    %234 = arith.mulf %229, %233 : vector<16x16xf32>
    %235 = arith.truncf %234 : vector<16x16xf32> to vector<16x16xbf16>
    %cst_90 = arith.constant dense<0.000000e+00> : vector<16x32xf32>
    %236 = tpu.matmul %235, %218, %cst_90 {dimension_numbers = #tpu.dot_dimension_numbers<[1], [0], [0], [1], [0, 0, 1, 1], [], []>} : vector<16x16xbf16>, vector<16x32xbf16>, vector<16x32xf32> -> vector<16x32xf32>
    %237 = arith.truncf %236 : vector<16x32xf32> to vector<16x32xbf16>
    %238 = vector.extract_strided_slice %184 {offsets = [32, 0], sizes = [32, 128], strides = [1, 1]} : vector<128x128xbf16> to vector<32x128xbf16>
    %cst_91 = arith.constant dense<0.000000e+00> : vector<16x128xf32>
    %239 = tpu.matmul %237, %238, %cst_91 {dimension_numbers = #tpu.dot_dimension_numbers<[1], [0], [0], [1], [0, 0, 1, 1], [], []>} : vector<16x32xbf16>, vector<32x128xbf16>, vector<16x128xf32> -> vector<16x128xf32>
    %240 = arith.addf %212, %239 : vector<16x128xf32>
    %241 = vector.extract_strided_slice %182 {offsets = [0, 64], sizes = [16, 32], strides = [1, 1]} : vector<16x384xf32> to vector<16x32xf32>
    %242 = arith.truncf %241 : vector<16x32xf32> to vector<16x32xbf16>
    %243 = vector.extract_strided_slice %182 {offsets = [0, 192], sizes = [16, 32], strides = [1, 1]} : vector<16x384xf32> to vector<16x32xf32>
    %244 = arith.truncf %243 : vector<16x32xf32> to vector<16x32xbf16>
    %245 = vector.extract_strided_slice %182 {offsets = [0, 320], sizes = [16, 32], strides = [1, 1]} : vector<16x384xf32> to vector<16x32xf32>
    %246 = arith.truncf %245 : vector<16x32xf32> to vector<16x32xbf16>
    "tpu.trace_start"() <{level = 10 : i32, message = "qd,kd->qk"}> : () -> ()
    %cst_92 = arith.constant dense<0.000000e+00> : vector<16x16xf32>
    %247 = tpu.matmul %242, %244, %cst_92 {dimension_numbers = #tpu.dot_dimension_numbers<[1], [1], [0], [0], [0, 0, 1, 0], [], []>} : vector<16x32xbf16>, vector<16x32xbf16>, vector<16x16xf32> -> vector<16x16xf32>
    "tpu.trace_stop"() : () -> ()
    %cst_93 = arith.constant 0.176776692 : f32
    %248 = vector.broadcast %cst_93 : f32 to vector<16x16xf32>
    %249 = arith.mulf %247, %248 : vector<16x16xf32>
    %c2_94 = arith.constant 2 : index
    %c0_95 = arith.constant 0 : index
    %c0_96 = arith.constant 0 : index
    %250 = vector.load %arg1[%c2_94, %c0_95, %c0_96] : memref<4x16x16xf32, #tpu.memory_space<vmem>>, vector<1x16x16xf32>
    %251 = vector.shape_cast %250 : vector<1x16x16xf32> to vector<16x16xf32>
    %252 = arith.addf %249, %251 : vector<16x16xf32>
    %cst_97 = arith.constant dense<0xFF800000> : vector<16xf32>
    %253 = vector.multi_reduction <maximumf>, %252, %cst_97 [1] : vector<16x16xf32> to vector<16xf32>
    %254 = vector.shape_cast %253 : vector<16xf32> to vector<16x1xf32>
    %255 = vector.broadcast %254 : vector<16x1xf32> to vector<16x16xf32>
    %256 = arith.subf %252, %255 : vector<16x16xf32>
    %257 = math.exp %256 : vector<16x16xf32>
    %cst_98 = arith.constant dense<0.000000e+00> : vector<16xf32>
    %258 = vector.multi_reduction <add>, %257, %cst_98 [1] : vector<16x16xf32> to vector<16xf32>
    %259 = vector.shape_cast %258 : vector<16xf32> to vector<16x1xf32>
    %260 = tpu.reciprocal %259 {approx = true} : vector<16x1xf32> -> vector<16x1xf32>
    %261 = vector.broadcast %260 : vector<16x1xf32> to vector<16x16xf32>
    %262 = arith.mulf %257, %261 : vector<16x16xf32>
    %263 = arith.truncf %262 : vector<16x16xf32> to vector<16x16xbf16>
    %cst_99 = arith.constant dense<0.000000e+00> : vector<16x32xf32>
    %264 = tpu.matmul %263, %246, %cst_99 {dimension_numbers = #tpu.dot_dimension_numbers<[1], [0], [0], [1], [0, 0, 1, 1], [], []>} : vector<16x16xbf16>, vector<16x32xbf16>, vector<16x32xf32> -> vector<16x32xf32>
    %265 = arith.truncf %264 : vector<16x32xf32> to vector<16x32xbf16>
    %266 = vector.extract_strided_slice %184 {offsets = [64, 0], sizes = [32, 128], strides = [1, 1]} : vector<128x128xbf16> to vector<32x128xbf16>
    %cst_100 = arith.constant dense<0.000000e+00> : vector<16x128xf32>
    %267 = tpu.matmul %265, %266, %cst_100 {dimension_numbers = #tpu.dot_dimension_numbers<[1], [0], [0], [1], [0, 0, 1, 1], [], []>} : vector<16x32xbf16>, vector<32x128xbf16>, vector<16x128xf32> -> vector<16x128xf32>
    %268 = arith.addf %240, %267 : vector<16x128xf32>
    %269 = vector.extract_strided_slice %182 {offsets = [0, 96], sizes = [16, 32], strides = [1, 1]} : vector<16x384xf32> to vector<16x32xf32>
    %270 = arith.truncf %269 : vector<16x32xf32> to vector<16x32xbf16>
    %271 = vector.extract_strided_slice %182 {offsets = [0, 224], sizes = [16, 32], strides = [1, 1]} : vector<16x384xf32> to vector<16x32xf32>
    %272 = arith.truncf %271 : vector<16x32xf32> to vector<16x32xbf16>
    %273 = vector.extract_strided_slice %182 {offsets = [0, 352], sizes = [16, 32], strides = [1, 1]} : vector<16x384xf32> to vector<16x32xf32>
    %274 = arith.truncf %273 : vector<16x32xf32> to vector<16x32xbf16>
    "tpu.trace_start"() <{level = 10 : i32, message = "qd,kd->qk"}> : () -> ()
    %cst_101 = arith.constant dense<0.000000e+00> : vector<16x16xf32>
    %275 = tpu.matmul %270, %272, %cst_101 {dimension_numbers = #tpu.dot_dimension_numbers<[1], [1], [0], [0], [0, 0, 1, 0], [], []>} : vector<16x32xbf16>, vector<16x32xbf16>, vector<16x16xf32> -> vector<16x16xf32>
    "tpu.trace_stop"() : () -> ()
    %cst_102 = arith.constant 0.176776692 : f32
    %276 = vector.broadcast %cst_102 : f32 to vector<16x16xf32>
    %277 = arith.mulf %275, %276 : vector<16x16xf32>
    %c3_103 = arith.constant 3 : index
    %c0_104 = arith.constant 0 : index
    %c0_105 = arith.constant 0 : index
    %278 = vector.load %arg1[%c3_103, %c0_104, %c0_105] : memref<4x16x16xf32, #tpu.memory_space<vmem>>, vector<1x16x16xf32>
    %279 = vector.shape_cast %278 : vector<1x16x16xf32> to vector<16x16xf32>
    %280 = arith.addf %277, %279 : vector<16x16xf32>
    %cst_106 = arith.constant dense<0xFF800000> : vector<16xf32>
    %281 = vector.multi_reduction <maximumf>, %280, %cst_106 [1] : vector<16x16xf32> to vector<16xf32>
    %282 = vector.shape_cast %281 : vector<16xf32> to vector<16x1xf32>
    %283 = vector.broadcast %282 : vector<16x1xf32> to vector<16x16xf32>
    %284 = arith.subf %280, %283 : vector<16x16xf32>
    %285 = math.exp %284 : vector<16x16xf32>
    %cst_107 = arith.constant dense<0.000000e+00> : vector<16xf32>
    %286 = vector.multi_reduction <add>, %285, %cst_107 [1] : vector<16x16xf32> to vector<16xf32>
    %287 = vector.shape_cast %286 : vector<16xf32> to vector<16x1xf32>
    %288 = tpu.reciprocal %287 {approx = true} : vector<16x1xf32> -> vector<16x1xf32>
    %289 = vector.broadcast %288 : vector<16x1xf32> to vector<16x16xf32>
    %290 = arith.mulf %285, %289 : vector<16x16xf32>
    %291 = arith.truncf %290 : vector<16x16xf32> to vector<16x16xbf16>
    %cst_108 = arith.constant dense<0.000000e+00> : vector<16x32xf32>
    %292 = tpu.matmul %291, %274, %cst_108 {dimension_numbers = #tpu.dot_dimension_numbers<[1], [0], [0], [1], [0, 0, 1, 1], [], []>} : vector<16x16xbf16>, vector<16x32xbf16>, vector<16x32xf32> -> vector<16x32xf32>
    %293 = arith.truncf %292 : vector<16x32xf32> to vector<16x32xbf16>
    %294 = vector.extract_strided_slice %184 {offsets = [96, 0], sizes = [32, 128], strides = [1, 1]} : vector<128x128xbf16> to vector<32x128xbf16>
    %cst_109 = arith.constant dense<0.000000e+00> : vector<16x128xf32>
    %295 = tpu.matmul %293, %294, %cst_109 {dimension_numbers = #tpu.dot_dimension_numbers<[1], [0], [0], [1], [0, 0, 1, 1], [], []>} : vector<16x32xbf16>, vector<32x128xbf16>, vector<16x128xf32> -> vector<16x128xf32>
    %296 = arith.addf %268, %295 : vector<16x128xf32>
    %c1_110 = arith.constant 1 : index
    %c0_111 = arith.constant 0 : index
    %c0_112 = arith.constant 0 : index
    %297 = vector.load %arg3[%c1_110, %c0_111, %c0_112] : memref<2x1x128xf32, #tpu.memory_space<vmem>>, vector<1x1x128xf32>
    %298 = vector.shape_cast %297 : vector<1x1x128xf32> to vector<1x128xf32>
    %299 = arith.mulf %296, %296 : vector<16x128xf32>
    %cst_113 = arith.constant dense<0.000000e+00> : vector<16xf32>
    %300 = vector.multi_reduction <add>, %299, %cst_113 [1] : vector<16x128xf32> to vector<16xf32>
    %301 = vector.shape_cast %300 : vector<16xf32> to vector<16x1xf32>
    %cst_114 = arith.constant 1.280000e+02 : f32
    %302 = vector.broadcast %cst_114 : f32 to vector<16x1xf32>
    %303 = arith.divf %301, %302 : vector<16x1xf32>
    %cst_115 = arith.constant 9.99999974E-6 : f32
    %304 = vector.broadcast %cst_115 : f32 to vector<16x1xf32>
    %305 = arith.addf %303, %304 : vector<16x1xf32>
    %306 = math.rsqrt %305 : vector<16x1xf32>
    %307 = vector.broadcast %306 : vector<16x1xf32> to vector<16x128xf32>
    %308 = arith.mulf %296, %307 : vector<16x128xf32>
    %309 = vector.broadcast %298 : vector<1x128xf32> to vector<16x128xf32>
    %310 = arith.mulf %308, %309 : vector<16x128xf32>
    %311 = arith.truncf %310 : vector<16x128xf32> to vector<16x128xbf16>
    %c1_116 = arith.constant 1 : index
    %c0_117 = arith.constant 0 : index
    %c0_118 = arith.constant 0 : index
    %312 = vector.load %arg6[%c1_116, %c0_117, %c0_118] : memref<2x128x256xbf16, #tpu.memory_space<vmem>>, vector<1x128x256xbf16>
    %313 = vector.shape_cast %312 : vector<1x128x256xbf16> to vector<128x256xbf16>
    %cst_119 = arith.constant dense<0.000000e+00> : vector<16x256xf32>
    %314 = tpu.matmul %311, %313, %cst_119 {dimension_numbers = #tpu.dot_dimension_numbers<[1], [0], [0], [1], [0, 0, 1, 1], [], []>} : vector<16x128xbf16>, vector<128x256xbf16>, vector<16x256xf32> -> vector<16x256xf32>
    %315 = vector.extract_strided_slice %314 {offsets = [0, 0], sizes = [16, 128], strides = [1, 1]} : vector<16x256xf32> to vector<16x128xf32>
    %316 = vector.extract_strided_slice %314 {offsets = [0, 128], sizes = [16, 128], strides = [1, 1]} : vector<16x256xf32> to vector<16x128xf32>
    %317 = arith.negf %315 : vector<16x128xf32>
    %318 = math.exp %317 : vector<16x128xf32>
    %cst_120 = arith.constant 1.000000e+00 : f32
    %319 = vector.broadcast %cst_120 : f32 to vector<16x128xf32>
    %320 = arith.addf %319, %318 : vector<16x128xf32>
    %321 = arith.divf %319, %320 : vector<16x128xf32>
    %322 = arith.mulf %315, %321 : vector<16x128xf32>
    %323 = arith.mulf %322, %316 : vector<16x128xf32>
    %324 = arith.truncf %323 : vector<16x128xf32> to vector<16x128xbf16>
    %c1_121 = arith.constant 1 : index
    %c0_122 = arith.constant 0 : index
    %c0_123 = arith.constant 0 : index
    %325 = vector.load %arg7[%c1_121, %c0_122, %c0_123] : memref<2x128x128xbf16, #tpu.memory_space<vmem>>, vector<1x128x128xbf16>
    %326 = vector.shape_cast %325 : vector<1x128x128xbf16> to vector<128x128xbf16>
    %cst_124 = arith.constant dense<0.000000e+00> : vector<16x128xf32>
    %327 = tpu.matmul %324, %326, %cst_124 {dimension_numbers = #tpu.dot_dimension_numbers<[1], [0], [0], [1], [0, 0, 1, 1], [], []>} : vector<16x128xbf16>, vector<128x128xbf16>, vector<16x128xf32> -> vector<16x128xf32>
    %328 = arith.addf %296, %327 : vector<16x128xf32>
    %c0_125 = arith.constant 0 : index
    %c0_126 = arith.constant 0 : index
    %329 = vector.load %arg8[%c0_125, %c0_126] : memref<1x128xf32, #tpu.memory_space<vmem>>, vector<1x128xf32>
    %330 = arith.mulf %328, %328 : vector<16x128xf32>
    %cst_127 = arith.constant dense<0.000000e+00> : vector<16xf32>
    %331 = vector.multi_reduction <add>, %330, %cst_127 [1] : vector<16x128xf32> to vector<16xf32>
    %332 = vector.shape_cast %331 : vector<16xf32> to vector<16x1xf32>
    %cst_128 = arith.constant 1.280000e+02 : f32
    %333 = vector.broadcast %cst_128 : f32 to vector<16x1xf32>
    %334 = arith.divf %332, %333 : vector<16x1xf32>
    %cst_129 = arith.constant 9.99999974E-6 : f32
    %335 = vector.broadcast %cst_129 : f32 to vector<16x1xf32>
    %336 = arith.addf %334, %335 : vector<16x1xf32>
    %337 = math.rsqrt %336 : vector<16x1xf32>
    %338 = vector.broadcast %337 : vector<16x1xf32> to vector<16x128xf32>
    %339 = arith.mulf %328, %338 : vector<16x128xf32>
    %340 = vector.broadcast %329 : vector<1x128xf32> to vector<16x128xf32>
    %341 = arith.mulf %339, %340 : vector<16x128xf32>
    %342 = arith.truncf %341 : vector<16x128xf32> to vector<16x128xbf16>
    %c0_130 = arith.constant 0 : index
    %c0_131 = arith.constant 0 : index
    %343 = vector.load %arg9[%c0_130, %c0_131] : memref<128x256xbf16, #tpu.memory_space<vmem>>, vector<128x256xbf16>
    %cst_132 = arith.constant dense<0.000000e+00> : vector<16x256xf32>
    %344 = tpu.matmul %342, %343, %cst_132 {dimension_numbers = #tpu.dot_dimension_numbers<[1], [0], [0], [1], [0, 0, 1, 1], [], []>} : vector<16x128xbf16>, vector<128x256xbf16>, vector<16x256xf32> -> vector<16x256xf32>
    %cst_133 = arith.constant dense<0xFF800000> : vector<16xf32>
    %345 = vector.multi_reduction <maximumf>, %344, %cst_133 [1] : vector<16x256xf32> to vector<16xf32>
    %346 = vector.shape_cast %345 : vector<16xf32> to vector<16x1xf32>
    %347 = tpu.iota {dimensions = array<i32: 1>} : vector<16x256xi32>
    %348 = vector.broadcast %346 : vector<16x1xf32> to vector<16x256xf32>
    %349 = arith.cmpf oeq, %344, %348 : vector<16x256xf32>
    %c256_i32 = arith.constant 256 : i32
    %350 = vector.broadcast %c256_i32 : i32 to vector<16x256xi32>
    %351 = arith.select %349, %347, %350 : vector<16x256xi1>, vector<16x256xi32>
    %cst_134 = arith.constant dense<2147483647> : vector<16xi32>
    %352 = vector.multi_reduction <minsi>, %351, %cst_134 [1] : vector<16x256xi32> to vector<16xi32>
    %353 = vector.shape_cast %352 : vector<16xi32> to vector<16x1xi32>
    %c0_135 = arith.constant 0 : index
    %c0_136 = arith.constant 0 : index
    %354 = vector.load %arg10[%c0_135, %c0_136] : memref<16x1xi32, #tpu.memory_space<vmem>>, vector<16x1xi32>
    tpu.vector_store %arg10[%c0_135, %c0_136], %353 {strides = array<i32>} : memref<16x1xi32, #tpu.memory_space<vmem>>, vector<16x1xi32>,
    return
  }
}

</mosaic_0001>

<bundles_post_ra>
// kernel: tile.9
= control target key start
LH: loop header
LB: loop body
LE: loop exit
PB: predicated region body
PF: predicated region fallthrough
CT: control target
= control target key end

     0   :  { %vm323_vm0 = vcmask 1047556   ;;  %s617_s10 = smov 8   ;;  %vm325_vm1 = vcmask 64512   ;;  %vm398_vm2 = vcmask 130112   ;;  %s908_s0 = inlined_call_operand.vmem [shape: f32[4,2,8,2,8], index: 0, kind: input, shape index: {}]   ;;  %s909_s1 = inlined_call_operand.vmem [shape: f32[4,16,16], index: 1, kind: output, shape index: {}]  }
   0x1   :  { %v595_v0 = vld [vmem:[%s908_s0 + $0xe] sm:$0x3]  ;;  %v596_v1 = vld [vmem:[%s908_s0 + $0xc] sm:$0x3]  ;;  %v597_v2 = vld [vmem:[%s908_s0 + $0xa] sm:$0x3] }
   0x2   :  { %289 = vst [vmem:[#allocation0 + $0x38] sm:$0x3] %v595_v0  ;;  %294 = vst [vmem:[#allocation0 + $0x30] sm:$0x3] %v596_v1  ;;  %v598_v3 = vld [vmem:[%s908_s0 + $0x8] sm:$0x3] }
   0x3   :  { %299 = vst [vmem:[#allocation0 + $0x28] sm:$0x3] %v597_v2  ;;  %v599_v4 = vld [vmem:[%s908_s0 + $0x6] sm:$0x3]  ;;  %v600_v5 = vld [vmem:[%s908_s0 + $0x4] sm:$0x3] }
   0x4   :  { %304 = vst [vmem:[#allocation0 + $0x20] sm:$0x3] %v598_v3  ;;  %309 = vst [vmem:[#allocation0 + $0x18] sm:$0x3] %v599_v4  ;;  %v601_v6 = vld [vmem:[%s908_s0 + $0x2] sm:$0x3] }
   0x5   :  { %314 = vst [vmem:[#allocation0 + $0x10] sm:$0x3] %v600_v5  ;;  %v319_v7 = vld [vmem:[%s908_s0] sm:$0x3]  ;;  %318 = vst [vmem:[#allocation0 + $0x8] sm:$0x3] %v601_v6 }
   0x6   :  { %320 = vst [vmem:[#allocation0] sm:$0x3] %v319_v7  ;;  %v587_v8 = vld [vmem:[%s908_s0 + $0x1e] sm:$0x3]  ;;  %v588_v9 = vld [vmem:[%s908_s0 + $0x1c] sm:$0x3] }
   0x7   :  { %v589_v10 = vld [vmem:[%s908_s0 + $0x1a] sm:$0x3]  ;;  %249 = vst [vmem:[#allocation0 + $0x78] sm:$0x3] %v587_v8  ;;  %254 = vst [vmem:[#allocation0 + $0x70] sm:$0x3] %v588_v9 }
   0x8   :  { %259 = vst [vmem:[#allocation0 + $0x68] sm:$0x3] %v589_v10  ;;  %v590_v11 = vld [vmem:[%s908_s0 + $0x18] sm:$0x3]  ;;  %v591_v12 = vld [vmem:[%s908_s0 + $0x16] sm:$0x3] }
   0x9   :  { %v592_v13 = vld [vmem:[%s908_s0 + $0x14] sm:$0x3]  ;;  %264 = vst [vmem:[#allocation0 + $0x60] sm:$0x3] %v590_v11  ;;  %269 = vst [vmem:[#allocation0 + $0x58] sm:$0x3] %v591_v12 }
   0xa   :  { %274 = vst [vmem:[#allocation0 + $0x50] sm:$0x3] %v592_v13  ;;  %v593_v14 = vld [vmem:[%s908_s0 + $0x12] sm:$0x3]  ;;  %v594_v15 = vld [vmem:[%s908_s0 + $0x10] sm:$0x3] }
   0xb   :  { %v563_v16 = vld [vmem:[%s908_s0 + $0x4e] sm:$0x3]  ;;  %279 = vst [vmem:[#allocation0 + $0x48] sm:$0x3] %v593_v14  ;;  %284 = vst [vmem:[#allocation0 + $0x40] sm:$0x3] %v594_v15 }
   0xc   :  { %129 = vst [vmem:[#allocation0 + $0x138] sm:$0x3] %v563_v16  ;;  %v564_v17 = vld [vmem:[%s908_s0 + $0x4c] sm:$0x3]  ;;  %v565_v18 = vld [vmem:[%s908_s0 + $0x4a] sm:$0x3] }
   0xd   :  { %v566_v19 = vld [vmem:[%s908_s0 + $0x48] sm:$0x3]  ;;  %134 = vst [vmem:[#allocation0 + $0x130] sm:$0x3] %v564_v17  ;;  %139 = vst [vmem:[#allocation0 + $0x128] sm:$0x3] %v565_v18 }
   0xe   :  { %144 = vst [vmem:[#allocation0 + $0x120] sm:$0x3] %v566_v19  ;;  %v567_v20 = vld [vmem:[%s908_s0 + $0x46] sm:$0x3]  ;;  %v568_v21 = vld [vmem:[%s908_s0 + $0x44] sm:$0x3] }
   0xf   :  { %v569_v22 = vld [vmem:[%s908_s0 + $0x42] sm:$0x3]  ;;  %149 = vst [vmem:[#allocation0 + $0x118] sm:$0x3] %v567_v20  ;;  %154 = vst [vmem:[#allocation0 + $0x110] sm:$0x3] %v568_v21 }
  0x10   :  { %159 = vst [vmem:[#allocation0 + $0x108] sm:$0x3] %v569_v22  ;;  %v570_v23 = vld [vmem:[%s908_s0 + $0x40] sm:$0x3]  ;;  %v555_v24 = vld [vmem:[%s908_s0 + $0x5e] sm:$0x3] }
  0x11   :  { %v556_v25 = vld [vmem:[%s908_s0 + $0x5c] sm:$0x3]  ;;  %v393_v26 = vld [vmem:[#allocation0 + $0x1] ss:$8 sm:$0xf0]  }
  0x12   :  { %164 = vst [vmem:[#allocation0 + $0x100] sm:$0x3] %v570_v23  ;;  %89 = vst [vmem:[#allocation0 + $0x178] sm:$0x3] %v555_v24  ;;  %v557_v27 = vld [vmem:[%s908_s0 + $0x5a] sm:$0x3] }
  0x13   :  { %94 = vst [vmem:[#allocation0 + $0x170] sm:$0x3] %v556_v25  ;;  %v391_v28 = vld [vmem:[#allocation0 + $0x1] ss:$8 sm:$0xf]  }
  0x14   :  { %99 = vst [vmem:[#allocation0 + $0x168] sm:$0x3] %v557_v27  ;;  %v558_v29 = vld [vmem:[%s908_s0 + $0x58] sm:$0x3]  ;;  %v395_v30 = vsel %vm323_vm0, %v393_v26, %v391_v28  ;;  %v559_v31 = vld [vmem:[%s908_s0 + $0x56] sm:$0x3] }
  0x15   :  { %104 = vst [vmem:[#allocation0 + $0x160] sm:$0x3] %v558_v29  ;;  %v560_v32 = vld [vmem:[%s908_s0 + $0x54] sm:$0x3]  ;;  %v561_v33 = vld [vmem:[%s908_s0 + $0x52] sm:$0x3]  ;;  %396 = vrot.lane.b32.xlu0 %v395_v30, %s617_s10 }
  0x16   :  { %v414_v34 = vld [vmem:[#allocation0 + $0x41] ss:$8 sm:$0xf0]   ;;  %109 = vst [vmem:[#allocation0 + $0x158] sm:$0x3] %v559_v31 }
  0x17   :  { %114 = vst [vmem:[#allocation0 + $0x150] sm:$0x3] %v560_v32  ;;  %119 = vst [vmem:[#allocation0 + $0x148] sm:$0x3] %v561_v33  ;;  %v562_v35 = vld [vmem:[%s908_s0 + $0x50] sm:$0x3] }
  0x18   :  { %v412_v36 = vld [vmem:[#allocation0 + $0x41] ss:$8 sm:$0xf]   ;;  %124 = vst [vmem:[#allocation0 + $0x140] sm:$0x3] %v562_v35 }
  0x19   :  { %v579_v37 = vld [vmem:[%s908_s0 + $0x2e] sm:$0x3]  ;;  %v416_v38 = vsel %vm323_vm0, %v414_v34, %v412_v36  ;;  %v403_v39 = vld [vmem:[#allocation0 + $0x101] ss:$8 sm:$0xf0]  }
  0x1a   :  { %209 = vst [vmem:[#allocation0 + $0xb8] sm:$0x3] %v579_v37  ;;  %v580_v40 = vld [vmem:[%s908_s0 + $0x2c] sm:$0x3]  ;;  %417 = vrot.lane.b32.xlu1 %v416_v38, %s617_s10  ;;  %v581_v41 = vld [vmem:[%s908_s0 + $0x2a] sm:$0x3] }
  0x1b   :  { %214 = vst [vmem:[#allocation0 + $0xb0] sm:$0x3] %v580_v40  ;;  %v582_v42 = vld [vmem:[%s908_s0 + $0x28] sm:$0x3]  ;;  %v583_v43 = vld [vmem:[%s908_s0 + $0x26] sm:$0x3] }
  0x1c   :  { %v401_v44 = vld [vmem:[#allocation0 + $0x101] ss:$8 sm:$0xf]   ;;  %219 = vst [vmem:[#allocation0 + $0xa8] sm:$0x3] %v581_v41 }
  0x1d   :  { %224 = vst [vmem:[#allocation0 + $0xa0] sm:$0x3] %v582_v42  ;;  %229 = vst [vmem:[#allocation0 + $0x98] sm:$0x3] %v583_v43  ;;  %v584_v45 = vld [vmem:[%s908_s0 + $0x24] sm:$0x3]  ;;  %v405_v46 = vsel %vm323_vm0, %v403_v39, %v401_v44 }
  0x1e   :  { %234 = vst [vmem:[#allocation0 + $0x90] sm:$0x3] %v584_v45  ;;  %v585_v47 = vld [vmem:[%s908_s0 + $0x22] sm:$0x3]  ;;  %v586_v48 = vld [vmem:[%s908_s0 + $0x20] sm:$0x3]  ;;  %406 = vrot.lane.b32.xlu0 %v405_v46, %s617_s10 }
  0x1f   :  { %v547_v49 = vld [vmem:[%s908_s0 + $0x6e] sm:$0x3]  ;;  %v425_v50 = vld [vmem:[#allocation0 + $0x141] ss:$8 sm:$0xf0]  }
  0x20   :  { %239 = vst [vmem:[#allocation0 + $0x88] sm:$0x3] %v585_v47  ;;  %244 = vst [vmem:[#allocation0 + $0x80] sm:$0x3] %v586_v48  ;;  %v548_v51 = vld [vmem:[%s908_s0 + $0x6c] sm:$0x3] }
  0x21   :  { %49 = vst [vmem:[#allocation0 + $0x1b8] sm:$0x3] %v547_v49  ;;  %54 = vst [vmem:[#allocation0 + $0x1b0] sm:$0x3] %v548_v51  ;;  %v549_v52 = vld [vmem:[%s908_s0 + $0x6a] sm:$0x3] }
  0x22   :  { %v550_v53 = vld [vmem:[%s908_s0 + $0x68] sm:$0x3]  ;;  %v551_v54 = vld [vmem:[%s908_s0 + $0x66] sm:$0x3]  ;;  %59 = vst [vmem:[#allocation0 + $0x1a8] sm:$0x3] %v549_v52 }
  0x23   :  { %v423_v55 = vld [vmem:[#allocation0 + $0x141] ss:$8 sm:$0xf]   ;;  %64 = vst [vmem:[#allocation0 + $0x1a0] sm:$0x3] %v550_v53 }
  0x24   :  { %69 = vst [vmem:[#allocation0 + $0x198] sm:$0x3] %v551_v54  ;;  %v552_v56 = vld [vmem:[%s908_s0 + $0x64] sm:$0x3]  ;;  %v427_v57 = vsel %vm323_vm0, %v425_v50, %v423_v55  ;;  %v553_v58 = vld [vmem:[%s908_s0 + $0x62] sm:$0x3] }
  0x25   :  { %74 = vst [vmem:[#allocation0 + $0x190] sm:$0x3] %v552_v56  ;;  %v554_v59 = vld [vmem:[%s908_s0 + $0x60] sm:$0x3]  ;;  %v571_v60 = vld [vmem:[%s908_s0 + $0x3e] sm:$0x3]  ;;  %428 = vrot.lane.b32.xlu1 %v427_v57, %s617_s10 }
  0x26   :  { %79 = vst [vmem:[#allocation0 + $0x188] sm:$0x3] %v553_v58  ;;  %84 = vst [vmem:[#allocation0 + $0x180] sm:$0x3] %v554_v59  ;;  %v572_v61 = vld [vmem:[%s908_s0 + $0x3c] sm:$0x3] }
  0x27   :  { %169 = vst [vmem:[#allocation0 + $0xf8] sm:$0x3] %v571_v60  ;;  %v573_v62 = vld [vmem:[%s908_s0 + $0x3a] sm:$0x3]  ;;  %v574_v63 = vld [vmem:[%s908_s0 + $0x38] sm:$0x3] }
  0x28   :  { %v436_v0 = vld [vmem:[#allocation0 + $0x81] ss:$8 sm:$0xf0]   ;;  %174 = vst [vmem:[#allocation0 + $0xf0] sm:$0x3] %v572_v61 }
  0x29   :  { %179 = vst [vmem:[#allocation0 + $0xe8] sm:$0x3] %v573_v62  ;;  %184 = vst [vmem:[#allocation0 + $0xe0] sm:$0x3] %v574_v63  ;;  %v575_v1 = vld [vmem:[%s908_s0 + $0x36] sm:$0x3] }
  0x2a   :  { %189 = vst [vmem:[#allocation0 + $0xd8] sm:$0x3] %v575_v1  ;;  %v576_v2 = vld [vmem:[%s908_s0 + $0x34] sm:$0x3]  ;;  %v577_v3 = vld [vmem:[%s908_s0 + $0x32] sm:$0x3] }
  0x2b   :  { %v578_v4 = vld [vmem:[%s908_s0 + $0x30] sm:$0x3]  ;;  %194 = vst [vmem:[#allocation0 + $0xd0] sm:$0x3] %v576_v2  ;;  %199 = vst [vmem:[#allocation0 + $0xc8] sm:$0x3] %v577_v3 }
  0x2c   :  { %v434_v5 = vld [vmem:[#allocation0 + $0x81] ss:$8 sm:$0xf]   ;;  %204 = vst [vmem:[#allocation0 + $0xc0] sm:$0x3] %v578_v4 }
  0x2d   :  { %v539_v6 = vld [vmem:[%s908_s0 + $0x7e] sm:$0x3]  ;;  %v438_v7 = vsel %vm323_vm0, %v436_v0, %v434_v5  ;;  %v540_v8 = vld [vmem:[%s908_s0 + $0x7c] sm:$0x3]  ;;  %v541_v9 = vld [vmem:[%s908_s0 + $0x7a] sm:$0x3] }
  0x2e   :  { %9 = vst [vmem:[#allocation0 + $0x1f8] sm:$0x3] %v539_v6  ;;  %v542_v10 = vld [vmem:[%s908_s0 + $0x78] sm:$0x3]  ;;  %439 = vrot.lane.b32.xlu0 %v438_v7, %s617_s10  ;;  %14 = vst [vmem:[#allocation0 + $0x1f0] sm:$0x3] %v540_v8 }
  0x2f   :  { %v447_v11 = vld [vmem:[#allocation0 + $0x181] ss:$8 sm:$0xf0]   ;;  %19 = vst [vmem:[#allocation0 + $0x1e8] sm:$0x3] %v541_v9 }
  0x30   :  { %24 = vst [vmem:[#allocation0 + $0x1e0] sm:$0x3] %v542_v10  ;;  %v543_v12 = vld [vmem:[%s908_s0 + $0x76] sm:$0x3]  ;;  %v544_v13 = vld [vmem:[%s908_s0 + $0x74] sm:$0x3] }
  0x31   :  { %29 = vst [vmem:[#allocation0 + $0x1d8] sm:$0x3] %v543_v12  ;;  %v545_v14 = vld [vmem:[%s908_s0 + $0x72] sm:$0x3]  ;;  %v546_v15 = vld [vmem:[%s908_s0 + $0x70] sm:$0x3] }
  0x32   :  { %v445_v16 = vld [vmem:[#allocation0 + $0x181] ss:$8 sm:$0xf]   ;;  %34 = vst [vmem:[#allocation0 + $0x1d0] sm:$0x3] %v544_v13 }
  0x33   :  { %39 = vst [vmem:[#allocation0 + $0x1c8] sm:$0x3] %v545_v14  ;;  %44 = vst [vmem:[#allocation0 + $0x1c0] sm:$0x3] %v546_v15  ;;  %v449_v18 = vsel %vm323_vm0, %v447_v11, %v445_v16 }
  0x34   :  { %v321_v17 = vld [vmem:[#allocation0] ss:$8 sm:$0xf]   ;;  %v458_v19 = vld [vmem:[#allocation0 + $0xc1] ss:$8 sm:$0xf0]   ;;  %450 = vrot.lane.b32.xlu1 %v449_v18, %s617_s10 }
  0x35   :  { %v322_v20 = vld [vmem:[#allocation0] ss:$8 sm:$0xf0]   ;;  %v456_v24 = vld [vmem:[#allocation0 + $0xc1] ss:$8 sm:$0xf]  }
  0x36   :  { %v324_v21 = vsel %vm323_vm0, %v322_v20, %v321_v17  ;;  %v328_v22 = vld [vmem:[#allocation0 + $0x40] ss:$8 sm:$0xf]   ;;  %v460_v27 = vsel %vm323_vm0, %v458_v19, %v456_v24 }
  0x37   :  { %v330_v23 = vld [vmem:[#allocation0 + $0x40] ss:$8 sm:$0xf0]   ;;  %326 = vst.msk [vmem:[%s909_s1] sm:$0xff] %vm325_vm1, %v324_v21   ;;  %461 = vrot.lane.b32.xlu0 %v460_v27, %s617_s10 }
  0x38   :  { %v332_v25 = vsel %vm323_vm0, %v330_v23, %v328_v22  ;;  %v355_v26 = vld [vmem:[#allocation0 + $0x100] ss:$8 sm:$0xf]   ;;  %v469_v30 = vld [vmem:[#allocation0 + $0x1c1] ss:$8 sm:$0xf0]  }
  0x39   :  { %602 = vst.msk [vmem:[%s909_s1 + $0x8] sm:$0xff] %vm325_vm1, %v332_v25   ;;  %v357_v28 = vld [vmem:[#allocation0 + $0x100] ss:$8 sm:$0xf0]  }
  0x3a   :  { %v364_v29 = vld [vmem:[#allocation0 + $0x140] ss:$8 sm:$0xf]   ;;  %v359_v31 = vsel %vm323_vm0, %v357_v28, %v355_v26  ;;  %v467_v36 = vld [vmem:[#allocation0 + $0x1c1] ss:$8 sm:$0xf]  }
  0x3b   :  { %v366_v32 = vld [vmem:[#allocation0 + $0x140] ss:$8 sm:$0xf0]   ;;  %605 = vst.msk [vmem:[%s909_s1 + $0x20] sm:$0xff] %vm325_vm1, %v359_v31   ;;  %v471_v39 = vsel %vm323_vm0, %v469_v30, %v467_v36 }
  0x3c   :  { %v368_v33 = vsel %vm323_vm0, %v366_v32, %v364_v29  ;;  %v337_v34 = vld [vmem:[#allocation0 + $0x80] ss:$8 sm:$0xf]   ;;  %472 = vrot.lane.b32.xlu1 %v471_v39, %s617_s10 }
  0x3d   :  { %v339_v35 = vld [vmem:[#allocation0 + $0x80] ss:$8 sm:$0xf0]   ;;  %606 = vst.msk [vmem:[%s909_s1 + $0x28] sm:$0xff] %vm325_vm1, %v368_v33  }
  0x3e   :  { %v341_v37 = vsel %vm323_vm0, %v339_v35, %v337_v34  ;;  %v373_v38 = vld [vmem:[#allocation0 + $0x180] ss:$8 sm:$0xf]  }
  0x3f   :  { %603 = vst.msk [vmem:[%s909_s1 + $0x10] sm:$0xff] %vm325_vm1, %v341_v37   ;;  %v375_v40 = vld [vmem:[#allocation0 + $0x180] ss:$8 sm:$0xf0]  }
  0x40   :  { %v346_v41 = vld [vmem:[#allocation0 + $0xc0] ss:$8 sm:$0xf]   ;;  %v377_v42 = vsel %vm323_vm0, %v375_v40, %v373_v38 }
  0x41   :  { %v348_v43 = vld [vmem:[#allocation0 + $0xc0] ss:$8 sm:$0xf0]   ;;  %607 = vst.msk [vmem:[%s909_s1 + $0x30] sm:$0xff] %vm325_vm1, %v377_v42  }
  0x42   :  { %v382_v44 = vld [vmem:[#allocation0 + $0x1c0] ss:$8 sm:$0xf]   ;;  %v350_v45 = vsel %vm323_vm0, %v348_v43, %v346_v41 }
  0x43   :  { %v384_v46 = vld [vmem:[#allocation0 + $0x1c0] ss:$8 sm:$0xf0]   ;;  %604 = vst.msk [vmem:[%s909_s1 + $0x18] sm:$0xff] %vm325_vm1, %v350_v45  }
  0x44   :  { %v386_v47 = vsel %vm323_vm0, %v384_v46, %v382_v44 }
  0x45   :  { %608 = vst.msk [vmem:[%s909_s1 + $0x38] sm:$0xff] %vm325_vm1, %v386_v47  }
  0x87   :  { %v397_v48 = vpop.permute.xlu0 %396  }
  0x88   :  { %399 = vst.msk [vmem:[%s909_s1] sm:$0xff] %vm398_vm2, %v397_v48  }
  0x8c   :  { %v418_v49 = vpop.permute.xlu1 %417  }
  0x8d   :  { %610 = vst.msk [vmem:[%s909_s1 + $0x8] sm:$0xff] %vm398_vm2, %v418_v49  }
  0x90   :  { %v407_v50 = vpop.permute.xlu0 %406  }
  0x91   :  { %609 = vst.msk [vmem:[%s909_s1 + $0x20] sm:$0xff] %vm398_vm2, %v407_v50  }
  0x97   :  { %v429_v51 = vpop.permute.xlu1 %428  }
  0x98   :  { %611 = vst.msk [vmem:[%s909_s1 + $0x28] sm:$0xff] %vm398_vm2, %v429_v51  }
  0xa0   :  { %v440_v52 = vpop.permute.xlu0 %439  }
  0xa1   :  { %612 = vst.msk [vmem:[%s909_s1 + $0x10] sm:$0xff] %vm398_vm2, %v440_v52  }
  0xa6   :  { %v451_v53 = vpop.permute.xlu1 %450  }
  0xa7   :  { %613 = vst.msk [vmem:[%s909_s1 + $0x30] sm:$0xff] %vm398_vm2, %v451_v53  }
  0xa9   :  { %v462_v54 = vpop.permute.xlu0 %461  }
  0xaa   :  { %614 = vst.msk [vmem:[%s909_s1 + $0x18] sm:$0xff] %vm398_vm2, %v462_v54  }
  0xae   :  { %v473_v55 = vpop.permute.xlu1 %472  }
  0xaf   :  { %615 = vst.msk [vmem:[%s909_s1 + $0x38] sm:$0xff] %vm398_vm2, %v473_v55  }

// kernel: alibi_transformer.1
= control target key start
LH: loop header
LB: loop body
LE: loop exit
PB: predicated region body
PF: predicated region fallthrough
CT: control target
= control target key end

     0   :  { %15 = vsyncpa [#allocation3], 0  ;;  %s4549_s0 = inlined_call_operand.vmem [shape: f32[16,128], index: 0, kind: input, shape index: {}]   ;;  %s4550_s1 = inlined_call_operand.vmem [shape: f32[4,16,16], index: 1, kind: input, shape index: {}]   ;;  %s4551_s2 = inlined_call_operand.vmem [shape: f32[2,1,128], index: 2, kind: input, shape index: {}]   ;;  %s4552_s3 = inlined_call_operand.vmem [shape: f32[2,1,128], index: 3, kind: input, shape index: {}]   ;;  %s4553_s4 = inlined_call_operand.vmem [shape: bf16[2,128,384], index: 4, kind: input, shape index: {}]   ;;  %s4554_s5 = inlined_call_operand.hbm [shape: bf16[2,128,128], index: 5, kind: input, shape index: {}]   ;;  %s4555_s6 = inlined_call_operand.vmem [shape: bf16[2,128,256], index: 6, kind: input, shape index: {}]   ;;  %s4556_s7 = inlined_call_operand.hbm [shape: bf16[2,128,128], index: 7, kind: input, shape index: {}]   ;;  %s4557_s8 = inlined_call_operand.vmem [shape: f32[1,128], index: 8, kind: input, shape index: {}]   ;;  %s4558_s9 = inlined_call_operand.hbm [shape: bf16[128,256], index: 9, kind: input, shape index: {}]   ;;  %s4559_s10 = inlined_call_operand.vmem [shape: s32[16,1], index: 10, kind: output, shape index: {}]  }
   0x1   :  { %16 = vsyncpa [#allocation5], 0  ;;  %s3839_s13 = smov [#allocation4]   ;;  %s3840_s15 = smov [#allocation2]  }
   0x2   :  { %s46_s14 = sshll.u32 %s3839_s13, 4  ;;  %s32_s16 = sshll.u32 %s3840_s15, 4  ;;  %s47_s14 = int_to_ptr.vmem [resolvable:$true] %s46_s14  ;;  %s33_s16 = int_to_ptr.vmem [resolvable:$true] %s32_s16 }
   0x3   :  { %s3783_s17 = scalar_lea.vmem %s47_s14, 2048  ;;  %p3788_p1 = scmp.lt.s32.totalorder %s47_s14, %s47_s14 }
   0x4   :  { %p3784_p0 = scmp.ne.s32.totalorder %s47_s14, %s3783_s17  ;;  %p3789_p2 = scmp.lt.s32.totalorder %s3783_s17, %s3783_s17 }
   0x6   :  { %p3790_p3 = por %p3789_p2, %p3788_p1 }
   0x8   :  { %p3791_p4 = pnand %p3790_p3, %p3784_p0 }
   0xa   :  { %3794 = shalt.err (!%p3791_p4)
}
   0xb   :  { %s3841_s18 = smov 64   ;;  %s3842_s19 = smov 4  }
   0xc   :  { %52 = dma.hbm_to_vmem [thread:$0]  %s4556_s7, 2048, %s47_s14, [#allocation5], %s3841_s18, %s3841_s18, %s3842_s19  }
   0xd   :  { %s3803_s22 = scalar_lea.vmem %s33_s16, 2048  ;;  %p3808_p6 = scmp.lt.s32.totalorder %s33_s16, %s33_s16 }
   0xe   :  { %p3804_p5 = scmp.ne.s32.totalorder %s33_s16, %s3803_s22  ;;  %p3809_p7 = scmp.lt.s32.totalorder %s3803_s22, %s3803_s22 }
  0x10   :  { %p3810_p8 = por %p3809_p7, %p3808_p6 }
  0x12   :  { %p3811_p9 = pnand %p3810_p8, %p3804_p5 }
  0x14   :  { %3814 = shalt.err (!%p3811_p9)
}
  0x15   :  { %38 = dma.hbm_to_vmem [thread:$0]  %s4554_s5, 2048, %s33_s16, [#allocation3], %s3841_s18, %s3841_s18, %s3842_s19  }
  0x16   :  { %s3843_s25 = smov [#allocation6]  }
  0x17   :  { %s60_s26 = sshll.u32 %s3843_s25, 4  ;;  %s61_s26 = int_to_ptr.vmem [resolvable:$true] %s60_s26 }
  0x18   :  { %s3823_s27 = scalar_lea.vmem %s61_s26, 2048  ;;  %p3828_p11 = scmp.lt.s32.totalorder %s61_s26, %s61_s26 }
  0x19   :  { %p3824_p10 = scmp.ne.s32.totalorder %s61_s26, %s3823_s27  ;;  %p3829_p12 = scmp.lt.s32.totalorder %s3823_s27, %s3823_s27 }
  0x1b   :  { %p3830_p13 = por %p3829_p12, %p3828_p11 }
  0x1d   :  { %p3831_p0 = pnand %p3830_p13, %p3824_p10 }
  0x1f   :  { %3834 = shalt.err (!%p3831_p0)
}
  0x20   :  { %s3844_s7 = smov 128   ;;  %s3845_s28 = smov 8  }
  0x21   :  { %66 = dma.hbm_to_vmem [thread:$0]  %s4558_s9, 2048, %s61_s26, [#allocation5], %s3844_s7, %s3844_s7, %s3845_s28  }
  0x22   :  { %3835 = dma.done.wait [#allocation3], 2048  }
  0x23   :  { %3836 = vsyncadd [#allocation3], 4294965248 }
  0x24   :  { %3837 = dma.done.wait [#allocation5], 4096  }
  0x25   :  { %3838 = vsyncadd [#allocation5], 4294963200  ;;  %v3846_v0 = vmov 0.0   ;;  %v3923_v1 = vld [vmem:[%s4549_s0] sm:$0xff]  ;;  %v3928_v2 = vld [vmem:[%s4549_s0 + $0x8] sm:$0xff]  ;;  %v3847_v26 = vmov 0  }
  0x26   :  { %3255 = vmatprep.subr.bf16.mxu1 %v3846_v0  ;;  %v80_v3 = vmul.f32 %v3923_v1, %v3923_v1  ;;  %v3507_v4 = vld [vmem:[%s4553_s4 + $0xac] ss:$12 sps:$4 sm:$0xff]   ;;  %v3509_v5 = vld [vmem:[%s4553_s4 + $0xa8] ss:$12 sps:$4 sm:$0xff]   ;;  %v3510_v6 = vld [vmem:[%s4553_s4 + $0xb0] ss:$12 sps:$4 sm:$0xff]   ;;  %v81_v7 = vmul.f32 %v3928_v2, %v3928_v2  ;;  %296 = vmatprep.mubr.bf16.mxu0 %v3847_v26 }
  0x27   :  { %264 = vmatprep.subr.bf16.mxu0 %v3507_v4  ;;  %3256 = vmatpush3.bf16.msra.mxu1 %v3510_v6  ;;  %v3511_v8 = vld [vmem:[%s4553_s4 + $0x94] ss:$12 sps:$4 sm:$0xff]   ;;  %v3513_v9 = vld [vmem:[%s4553_s4 + $0x90] ss:$12 sps:$4 sm:$0xff]   ;;  %v3514_v10 = vld [vmem:[%s4553_s4 + $0x98] ss:$12 sps:$4 sm:$0xff]  }
  0x28   :  { %82 = vadd.xlane.f32.xlu0 %v80_v3  ;;  %265 = vmatpush1.bf16.msra.mxu0 %v3509_v5  ;;  %v3515_v11 = vld [vmem:[%s4553_s4 + $0x7c] ss:$12 sps:$4 sm:$0xff]   ;;  %v3517_v12 = vld [vmem:[%s4553_s4 + $0x78] ss:$12 sps:$4 sm:$0xff]   ;;  %v3518_v13 = vld [vmem:[%s4553_s4 + $0x80] ss:$12 sps:$4 sm:$0xff]  }
  0x29   :  { %3257 = vmatprep.subr.bf16.mxu1 %v3846_v0  ;;  %266 = vmatprep.subr.bf16.mxu0 %v3511_v8  ;;  %v3519_v14 = vld [vmem:[%s4553_s4 + $0x64] ss:$12 sps:$4 sm:$0xff]   ;;  %v3521_v15 = vld [vmem:[%s4553_s4 + $0x60] ss:$12 sps:$4 sm:$0xff]   ;;  %v3522_v16 = vld [vmem:[%s4553_s4 + $0x68] ss:$12 sps:$4 sm:$0xff]  }
  0x2a   :  { %v3523_v17 = vld [vmem:[%s4553_s4 + $0x4c] ss:$12 sps:$4 sm:$0xff]   ;;  %v3525_v18 = vld [vmem:[%s4553_s4 + $0x48] ss:$12 sps:$4 sm:$0xff]   ;;  %v3526_v19 = vld [vmem:[%s4553_s4 + $0x50] ss:$12 sps:$4 sm:$0xff]  }
  0x2b   :  { %3258 = vmatpush3.bf16.msra.mxu1 %v3514_v10  ;;  %v3527_v20 = vld [vmem:[%s4553_s4 + $0x34] ss:$12 sps:$4 sm:$0xff]   ;;  %v3529_v21 = vld [vmem:[%s4553_s4 + $0x30] ss:$12 sps:$4 sm:$0xff]   ;;  %v3530_v22 = vld [vmem:[%s4553_s4 + $0x38] ss:$12 sps:$4 sm:$0xff]  }
  0x2c   :  { %84 = vadd.xlane.f32.xlu0 %v81_v7  ;;  %267 = vmatpush1.bf16.msra.mxu0 %v3513_v9  ;;  %v3531_v23 = vld [vmem:[%s4553_s4 + $0x1c] ss:$12 sps:$4 sm:$0xff]   ;;  %v3533_v24 = vld [vmem:[%s4553_s4 + $0x18] ss:$12 sps:$4 sm:$0xff]   ;;  %v3534_v25 = vld [vmem:[%s4553_s4 + $0x20] ss:$12 sps:$4 sm:$0xff]  }
  0x2d   :  { %3259 = vmatprep.subr.bf16.mxu1 %v3846_v0  ;;  %268 = vmatprep.subr.bf16.mxu0 %v3515_v11  ;;  %vm3848_vm0 = vmmov 0   ;;  %v3535_v27 = vld [vmem:[%s4553_s4 + $0x4] ss:$12 sps:$4 sm:$0xff]   ;;  %v3537_v28 = vld [vmem:[%s4553_s4] ss:$12 sps:$4 sm:$0xff]   ;;  %vm367_vm1 = vcmask 261120  }
  0x2e   :  { %3271 = vmatprep.mubr.msk.bf16.mxu1 %vm3848_vm0, %v3846_v0  ;;  %v3538_v29 = vld [vmem:[%s4553_s4 + $0x8] ss:$12 sps:$4 sm:$0xff]   ;;  %v2940_v39 = vld [vmem:[%s4551_s2] ss:$0 sm:$0xff]  ;;  %vm421_vm2 = vcmask 130048   ;;  %s3849_s21 = smov 96  }
  0x2f   :  { %3260 = vmatpush3.bf16.msra.mxu1 %v3518_v13  ;;  %v417_v57 = vld [vmem:[%s4550_s1] sm:$0xff]  ;;  %v418_v62 = vld [vmem:[%s4550_s1 + $0x8] sm:$0xff]  ;;  %s3850_s29 = smov 32   ;;  %vm2931_vm11 = vcmask 7168  }
  0x30   :  { %269 = vmatpush1.bf16.msra.mxu0 %v3517_v12  ;;  %3261 = vmatprep.subr.bf16.mxu1 %v3846_v0 }
  0x31   :  { %270 = vmatprep.subr.bf16.mxu0 %v3519_v14 }
  0x33   :  { %3262 = vmatpush3.bf16.msra.mxu1 %v3522_v16 }
  0x34   :  { %271 = vmatpush1.bf16.msra.mxu0 %v3521_v15  ;;  %3263 = vmatprep.subr.bf16.mxu1 %v3846_v0 }
  0x35   :  { %272 = vmatprep.subr.bf16.mxu0 %v3523_v17 }
  0x37   :  { %3264 = vmatpush3.bf16.msra.mxu1 %v3526_v19 }
  0x38   :  { %273 = vmatpush1.bf16.msra.mxu0 %v3525_v18  ;;  %3265 = vmatprep.subr.bf16.mxu1 %v3846_v0 }
  0x39   :  { %274 = vmatprep.subr.bf16.mxu0 %v3527_v20 }
  0x3b   :  { %3266 = vmatpush3.bf16.msra.mxu1 %v3530_v22 }
  0x3c   :  { %275 = vmatpush1.bf16.msra.mxu0 %v3529_v21  ;;  %3267 = vmatprep.subr.bf16.mxu1 %v3846_v0 }
  0x3d   :  { %276 = vmatprep.subr.bf16.mxu0 %v3531_v23  ;;  %v3539_v23 = vld [vmem:[#allocation2 + $0x8] sm:$0xff]  }
  0x3f   :  { %3268 = vmatpush3.bf16.msra.mxu1 %v3534_v25  ;;  %v3540_v25 = vld [vmem:[#allocation2] sm:$0xff]  }
  0x40   :  { %277 = vmatpush1.bf16.msra.mxu0 %v3533_v24  ;;  %3269 = vmatprep.subr.bf16.mxu1 %v3846_v0 }
  0x41   :  { %278 = vmatprep.subr.bf16.mxu0 %v3535_v27 }
  0x43   :  { %3270 = vmatpush3.bf16.msra.mxu1 %v3538_v29 }
  0x44   :  { %279 = vmatpush1.bf16.msra.mxu0 %v3537_v28  ;;  %3275 = vmatprep.subr.bf16.mxu1 %v3846_v0 }
  0x45   :  { %3301 = vmatprep.subr.bf16.mxu0 %v3846_v0 }
  0xb1   :  { %v83_v30 = vpop.xlane.xlu0 %82 }
  0xb2   :  { %v87_v31 = vmul.f32 0.0078125, %v83_v30 }
  0xb4   :  { %v89_v32 = vadd.f32 1e-05, %v87_v31 }
  0xb5   :  { %v85_v33 = vpop.xlane.xlu0 %84 }
  0xb6   :  { %3675 = vrsqrt.f32 %v89_v32  ;;  %v88_v34 = vmul.f32 0.0078125, %v85_v33 }
  0xb8   :  { %v90_v35 = vadd.f32 1e-05, %v88_v34 }
  0xba   :  { %3677 = vrsqrt.f32 %v90_v35 }
  0xc3   :  { %v3676_v36 = vpop.eup %3675 }
  0xc4   :  { %v93_v37 = vmul.f32 %v3676_v36, %v3923_v1 }
  0xc6   :  { %v101_v41 = vmul.f32 %v2940_v39, %v93_v37 }
  0xc7   :  { %v3678_v38 = vpop.eup %3677 }
  0xc8   :  { %v94_v40 = vmul.f32 %v3678_v38, %v3928_v2 }
  0xca   :  { %v102_v42 = vmul.f32 %v2940_v39, %v94_v40  ;;  %v2971_v40 = vld [vmem:[%s4550_s1 + $0x10] sm:$0xff] }
  0xcc   :  { %v103_v43 = vpack.c.bf16 %v102_v42, %v101_v41 }
  0xce   :  { %297 = vmatmul.mubr.bf16.vlgmr.msra.gmra.mxu0 %v103_v43  ;;  %3272 = vmatmul.mubr.bf16.vlgmr.msra.gmra.mxu1 %v103_v43 }
  0xcf   :  { %3277 = vmatprep.mubr.msk.bf16.mxu1 %vm3848_vm0, %v3846_v0  ;;  %3303 = vmatprep.mubr.msk.bf16.mxu0 %vm3848_vm0, %v3846_v0 }
 0x18e   :  { %v298_v44 = vpop.f32.mrf.mxu0  ;;  %v341_v45 = vpop.f32.mrf.mxu1 }
 0x190   :  { %v300_v46 = vpop.f32.mrf.mxu0  ;;  %v3273_v47 = vpop.f32.mrf.mxu1 }
 0x192   :  { %v302_v48 = vpop.f32.mrf.mxu0  ;;  %v344_v49 = vpop.f32.mrf.mxu1 }
 0x193   :  { %v4032_v54 = vpack.c.bf16 %v302_v48, %v298_v44  ;;  %v4034_v55 = vpack.c.bf16 %v344_v49, %v341_v45  ;;  %v2972_v45 = vld [vmem:[%s4550_s1 + $0x18] sm:$0xff] }
 0x194   :  { %v304_v50 = vpop.f32.mrf.mxu0  ;;  %v3274_v51 = vpop.f32.mrf.mxu1 }
 0x195   :  { %v4027_v52 = vpack.c.bf16 %v304_v50, %v300_v46 }
 0x197   :  { %v372_v53 = vsel %vm367_vm1, %v4027_v52, 0 }
 0x198   :  { %3276 = vmatpush3.bf16.xpose.msra.mxu1 %v372_v53 }
 0x199   :  { %3281 = vmatprep.subr.bf16.mxu1 %v3846_v0 }
 0x19f   :  { %3278 = vmatmul.mubr.msk.bf16.vlgmr.msra.gmra.mxu1 %vm367_vm1, %v4032_v54 }
 0x1a0   :  { %3282 = vmatpush3.bf16.msra.mxu1 %v4034_v55  ;;  %3283 = vmatprep.mubr.msk.bf16.mxu1 %vm3848_vm0, %v3846_v0 }
 0x1a1   :  { %3287 = vmatprep.subr.bf16.mxu1 %v3846_v0 }
 0x25f   :  { %v408_v56 = vpop.f32.mrf.mxu1 }
 0x260   :  { %v415_v58 = vmul.f32 0.17677669, %v408_v56 }
 0x261   :  { %v3279_v59 = vpop.f32.mrf.mxu1 }
 0x262   :  { %v419_v60 = vadd.f32 %v417_v57, %v415_v58 }
 0x263   :  { %v411_v61 = vpop.f32.mrf.mxu1 }
 0x264   :  { %v416_v63 = vmul.f32 0.17677669, %v411_v61  ;;  %v422_v3 = vsel %vm421_vm2, %v419_v60, -inf }
 0x265   :  { %423 = vmax.xlane.f32.xlu1 %v422_v3  ;;  %v3280_v4 = vpop.f32.mrf.mxu1 }
 0x266   :  { %v420_v5 = vadd.f32 %v418_v62, %v416_v63 }
 0x268   :  { %v425_v6 = vsel %vm421_vm2, %v420_v5, -inf }
 0x269   :  { %426 = vmax.xlane.f32.xlu1 %v425_v6 }
 0x2ee   :  { %v424_v7 = vpop.xlane.xlu1 %423 }
 0x2ef   :  { %v428_v8 = vsub.f32 %v419_v60, %v424_v7 }
 0x2f1   :  { %v430_v9 = vmul.f32 1.442695, %v428_v8 }
 0x2f2   :  { %v427_v10 = vpop.xlane.xlu1 %426 }
 0x2f3   :  { %3679 = vpow2.f32 %v430_v9  ;;  %v429_v11 = vsub.f32 %v420_v5, %v427_v10 }
 0x2f5   :  { %v432_v12 = vmul.f32 1.442695, %v429_v11 }
 0x2f7   :  { %3681 = vpow2.f32 %v432_v12 }
 0x300   :  { %v3680_v13 = vpop.eup %3679 }
 0x301   :  { %v434_v14 = vsel %vm421_vm2, %v3680_v13, 0.0 }
 0x302   :  { %435 = vadd.xlane.f32.xlu0 %v434_v14  ;;  %v3541_v14 = vld [vmem:[#allocation2 + $0x18] sm:$0xff]  }
 0x304   :  { %v3682_v15 = vpop.eup %3681 }
 0x305   :  { %v437_v16 = vsel %vm421_vm2, %v3682_v15, 0.0 }
 0x306   :  { %438 = vadd.xlane.f32.xlu1 %v437_v16 }
 0x317   :  { %549 = vrot.lane.b32.xlu1 %v4032_v54, %s3849_s21 }
 0x318   :  { %552 = vrot.lane.b32.xlu0 %v4027_v52, %s3849_s21 }
 0x38b   :  { %v436_v17 = vpop.xlane.xlu0 %435 }
 0x38c   :  { %3683 = vrcp.f32 %v436_v17 }
 0x38f   :  { %v439_v18 = vpop.xlane.xlu1 %438  ;;  %v553_v29 = vpop.permute.xlu0 %552 }
 0x390   :  { %3685 = vrcp.f32 %v439_v18  ;;  %v558_v33 = vsel %vm367_vm1, %v553_v29, 0 }
 0x393   :  { %v550_v34 = vpop.permute.xlu1 %549 }
 0x399   :  { %v3684_v19 = vpop.eup %3683 }
 0x39a   :  { %v442_v21 = vmul.f32 %v3684_v19, %v3680_v13 }
 0x39d   :  { %v3686_v20 = vpop.eup %3685 }
 0x39e   :  { %v443_v22 = vmul.f32 %v3686_v20, %v3682_v15  ;;  %v3542_v15 = vld [vmem:[#allocation2 + $0x10] sm:$0xff]  }
 0x3a0   :  { %v444_v24 = vpack.c.bf16 %v443_v22, %v442_v21  ;;  %v2978_v22 = vld [vmem:[%s4550_s1 + $0x20] sm:$0xff] }
 0x3a2   :  { %3284 = vmatmul.mubr.msk.bf16.vlgmr.msra.gmra.mxu1 %vm421_vm2, %v444_v24 }
 0x3a3   :  { %3288 = vmatpush3.bf16.msra.mxu1 %v3539_v23  ;;  %3291 = vmatprep.mubr.msk.bf16.mxu1 %vm3848_vm0, %v3846_v0 }
 0x3a4   :  { %3289 = vmatprep.subr.bf16.mxu1 %v3846_v0 }
 0x3a7   :  { %3290 = vmatpush3.bf16.msra.mxu1 %v3540_v25 }
 0x3a8   :  { %3295 = vmatprep.subr.bf16.mxu1 %v3846_v0 }
 0x462   :  { %v482_v27 = vpop.f32.mrf.mxu1 }
 0x464   :  { %v3285_v28 = vpop.f32.mrf.mxu1 }
 0x465   :  { %v2979_v28 = vld [vmem:[%s4550_s1 + $0x28] sm:$0xff] }
 0x466   :  { %v485_v30 = vpop.f32.mrf.mxu1 }
 0x467   :  { %v489_v31 = vpack.c.bf16 %v485_v30, %v482_v27 }
 0x468   :  { %v3286_v32 = vpop.f32.mrf.mxu1 }
 0x469   :  { %3292 = vmatmul.mubr.msk.bf16.vlgmr.msra.gmra.mxu1 %vm367_vm1, %v489_v31 }
 0x46a   :  { %3296 = vmatpush3.bf16.xpose.msra.mxu1 %v558_v33  ;;  %3297 = vmatprep.mubr.msk.bf16.mxu1 %vm3848_vm0, %v3846_v0 }
 0x46b   :  { %3307 = vmatprep.subr.bf16.mxu1 %v3846_v0 }
 0x471   :  { %3298 = vmatmul.mubr.msk.bf16.vlgmr.msra.gmra.mxu1 %vm367_vm1, %v550_v34 }
 0x472   :  { %3311 = vmatprep.mubr.msk.bf16.mxu1 %vm3848_vm0, %v3846_v0  ;;  %3308 = vmatpush3.bf16.msra.mxu1 %v3541_v14  ;;  %v2986_v14 = vld [vmem:[%s4550_s1 + $0x38] sm:$0xff] }
 0x473   :  { %3309 = vmatprep.subr.bf16.mxu1 %v3846_v0 }
 0x476   :  { %3310 = vmatpush3.bf16.msra.mxu1 %v3542_v15 }
 0x477   :  { %3321 = vmatprep.subr.bf16.mxu1 %v3846_v0 }
 0x529   :  { %v4069_v35 = vpop.f32.mrf.mxu1 }
 0x52b   :  { %v3293_v36 = vpop.f32.mrf.mxu1 }
 0x52d   :  { %v4071_v37 = vpop.f32.mrf.mxu1 }
 0x52f   :  { %v3294_v38 = vpop.f32.mrf.mxu1 }
 0x531   :  { %v594_v39 = vpop.f32.mrf.mxu1 }
 0x532   :  { %v601_v41 = vmul.f32 0.17677669, %v594_v39 }
 0x533   :  { %v3299_v42 = vpop.f32.mrf.mxu1 }
 0x534   :  { %v606_v43 = vadd.f32 %v2971_v40, %v601_v41 }
 0x535   :  { %v597_v44 = vpop.f32.mrf.mxu1 }
 0x536   :  { %v602_v46 = vmul.f32 0.17677669, %v597_v44  ;;  %v608_v47 = vsel %vm421_vm2, %v606_v43, -inf }
 0x537   :  { %609 = vmax.xlane.f32.xlu1 %v608_v47  ;;  %v3300_v48 = vpop.f32.mrf.mxu1 }
 0x538   :  { %v607_v49 = vadd.f32 %v2972_v45, %v602_v46 }
 0x53a   :  { %v611_v50 = vsel %vm421_vm2, %v607_v49, -inf }
 0x53b   :  { %612 = vmax.xlane.f32.xlu0 %v611_v50  ;;  %v547_v50 = vadd.f32 %v4071_v37, %v3928_v2  ;;  %v3543_v37 = vld [vmem:[#allocation2 + $0x28] sm:$0xff]  }
 0x5c0   :  { %v610_v51 = vpop.xlane.xlu1 %609 }
 0x5c1   :  { %v614_v53 = vsub.f32 %v606_v43, %v610_v51 }
 0x5c3   :  { %v616_v56 = vmul.f32 1.442695, %v614_v53 }
 0x5c4   :  { %v613_v57 = vpop.xlane.xlu0 %612 }
 0x5c5   :  { %3687 = vpow2.f32 %v616_v56  ;;  %v615_v58 = vsub.f32 %v607_v49, %v613_v57 }
 0x5c7   :  { %v618_v59 = vmul.f32 1.442695, %v615_v58 }
 0x5c9   :  { %3689 = vpow2.f32 %v618_v59 }
 0x5d2   :  { %v3688_v60 = vpop.eup %3687 }
 0x5d3   :  { %v620_v61 = vsel %vm421_vm2, %v3688_v60, 0.0 }
 0x5d4   :  { %621 = vadd.xlane.f32.xlu0 %v620_v61 }
 0x5d6   :  { %v3690_v62 = vpop.eup %3689 }
 0x5d7   :  { %v623_v63 = vsel %vm421_vm2, %v3690_v62, 0.0 }
 0x5d8   :  { %624 = vadd.xlane.f32.xlu1 %v623_v63  ;;  %v3544_v63 = vld [vmem:[#allocation2 + $0x20] sm:$0xff]  }
 0x5e9   :  { %740 = vrot.lane.b32.xlu1 %v4027_v52, %s3841_s18 }
 0x5ea   :  { %632 = vrot.lane.b32.xlu0 %v4034_v55, %s3849_s21 }
 0x5ed   :  { %738 = vrot.lane.b32.xlu1 %v4032_v54, %s3841_s18 }
 0x65d   :  { %v622_v3 = vpop.xlane.xlu0 %621 }
 0x65e   :  { %3691 = vrcp.f32 %v622_v3 }
 0x661   :  { %v625_v4 = vpop.xlane.xlu1 %624  ;;  %v633_v5 = vpop.permute.xlu0 %632 }
 0x662   :  { %3693 = vrcp.f32 %v625_v4  ;;  %3302 = vmatpush3.bf16.msra.mxu0 %v633_v5 }
 0x663   :  { %3315 = vmatprep.subr.bf16.mxu0 %v3846_v0 }
 0x665   :  { %v741_v10 = vpop.permute.xlu1 %740 }
 0x666   :  { %v746_v12 = vsel %vm367_vm1, %v741_v10, 0 }
 0x669   :  { %v739_v13 = vpop.permute.xlu1 %738 }
 0x66b   :  { %v3692_v6 = vpop.eup %3691 }
 0x66c   :  { %v628_v8 = vmul.f32 %v3692_v6, %v3688_v60 }
 0x66f   :  { %v3694_v7 = vpop.eup %3693 }
 0x670   :  { %v629_v9 = vmul.f32 %v3694_v7, %v3690_v62 }
 0x672   :  { %v630_v11 = vpack.c.bf16 %v629_v9, %v628_v8  ;;  %v2985_v9 = vld [vmem:[%s4550_s1 + $0x30] sm:$0xff] }
 0x674   :  { %3304 = vmatmul.mubr.msk.bf16.vlgmr.msra.gmra.mxu0 %vm421_vm2, %v630_v11 }
 0x675   :  { %3316 = vmatpush3.bf16.xpose.msra.mxu0 %v746_v12  ;;  %3317 = vmatprep.mubr.msk.bf16.mxu0 %vm3848_vm0, %v3846_v0 }
 0x676   :  { %3327 = vmatprep.subr.bf16.mxu0 %v3846_v0 }
 0x67c   :  { %3318 = vmatmul.mubr.msk.bf16.vlgmr.msra.gmra.mxu0 %vm367_vm1, %v739_v13 }
 0x67d   :  { %3331 = vmatprep.mubr.msk.bf16.mxu0 %vm3848_vm0, %v3846_v0  ;;  %3328 = vmatpush3.bf16.msra.mxu0 %v3543_v37  ;;  %v3555_v37 = vld [vmem:[%s4555_s6 + $0x54] ss:$8 sps:$4 sm:$0xff]  }
 0x67e   :  { %3329 = vmatprep.subr.bf16.mxu0 %v3846_v0 }
 0x681   :  { %3330 = vmatpush3.bf16.msra.mxu0 %v3544_v63  ;;  %v3553_v63 = vld [vmem:[%s4555_s6 + $0x50] ss:$8 sps:$4 sm:$0xff]  }
 0x682   :  { %3341 = vmatprep.subr.bf16.mxu0 %v3846_v0 }
 0x734   :  { %v672_v16 = vpop.f32.mrf.mxu0 }
 0x736   :  { %v3305_v17 = vpop.f32.mrf.mxu0 }
 0x738   :  { %v675_v18 = vpop.f32.mrf.mxu0 }
 0x739   :  { %v679_v19 = vpack.c.bf16 %v675_v18, %v672_v16 }
 0x73a   :  { %v3306_v20 = vpop.f32.mrf.mxu0 }
 0x73b   :  { %3312 = vmatmul.mubr.msk.bf16.vlgmr.msra.gmra.mxu1 %vm367_vm1, %v679_v19 }
 0x73c   :  { %v782_v21 = vpop.f32.mrf.mxu0  ;;  %3323 = vmatprep.mubr.msk.bf16.mxu1 %vm3848_vm0, %v3846_v0 }
 0x73d   :  { %v789_v23 = vmul.f32 0.17677669, %v782_v21 }
 0x73e   :  { %v3319_v24 = vpop.f32.mrf.mxu0 }
 0x73f   :  { %v794_v25 = vadd.f32 %v2978_v22, %v789_v23 }
 0x740   :  { %v785_v27 = vpop.f32.mrf.mxu0 }
 0x741   :  { %v790_v29 = vmul.f32 0.17677669, %v785_v27  ;;  %v796_v30 = vsel %vm421_vm2, %v794_v25, -inf }
 0x742   :  { %797 = vmax.xlane.f32.xlu1 %v796_v30  ;;  %v3320_v31 = vpop.f32.mrf.mxu0 }
 0x743   :  { %v795_v32 = vadd.f32 %v2979_v28, %v790_v29 }
 0x745   :  { %v799_v33 = vsel %vm421_vm2, %v795_v32, -inf }
 0x746   :  { %800 = vmax.xlane.f32.xlu0 %v799_v33 }
 0x753   :  { %819 = vrot.lane.b32.xlu1 %v4034_v55, %s3841_s18 }
 0x757   :  { %925 = vrot.lane.b32.xlu1 %v4032_v54, %s3850_s29  ;;  %v546_v54 = vadd.f32 %v4069_v35, %v3923_v1 }
 0x7cb   :  { %v798_v34 = vpop.xlane.xlu1 %797 }
 0x7cc   :  { %v802_v36 = vsub.f32 %v794_v25, %v798_v34 }
 0x7ce   :  { %v804_v38 = vmul.f32 1.442695, %v802_v36 }
 0x7cf   :  { %v820_v39 = vpop.permute.xlu1 %819  ;;  %v801_v40 = vpop.xlane.xlu0 %800 }
 0x7d0   :  { %3695 = vpow2.f32 %v804_v38  ;;  %v803_v41 = vsub.f32 %v795_v32, %v801_v40  ;;  %3322 = vmatpush3.bf16.msra.mxu1 %v820_v39 }
 0x7d1   :  { %3335 = vmatprep.subr.bf16.mxu1 %v3846_v0 }
 0x7d2   :  { %v806_v42 = vmul.f32 1.442695, %v803_v41 }
 0x7d3   :  { %v926_v2 = vpop.permute.xlu1 %925 }
 0x7d4   :  { %3697 = vpow2.f32 %v806_v42 }
 0x7dd   :  { %v3696_v43 = vpop.eup %3695 }
 0x7de   :  { %v808_v44 = vsel %vm421_vm2, %v3696_v43, 0.0 }
 0x7df   :  { %809 = vadd.xlane.f32.xlu0 %v808_v44 }
 0x7e1   :  { %v3698_v45 = vpop.eup %3697 }
 0x7e2   :  { %v811_v46 = vsel %vm421_vm2, %v3698_v45, 0.0 }
 0x7e3   :  { %812 = vadd.xlane.f32.xlu0 %v811_v46 }
 0x7f9   :  { %927 = vrot.lane.b32.xlu0 %v4027_v52, %s3850_s29 }
 0x7fb   :  { %v729_v47 = vpop.f32.mrf.mxu1 }
 0x7fc   :  { %v4122_v48 = vadd.f32 %v729_v47, %v546_v54  ;;  %v3546_v54 = vld [vmem:[#allocation2 + $0x30] sm:$0xff]  }
 0x7fd   :  { %v3313_v49 = vpop.f32.mrf.mxu1 }
 0x7ff   :  { %v732_v51 = vpop.f32.mrf.mxu1 }
 0x800   :  { %v4126_v53 = vadd.f32 %v732_v51, %v547_v50 }
 0x801   :  { %v3314_v56 = vpop.f32.mrf.mxu1 }
 0x802   :  { %v3549_v56 = vld [vmem:[%s4555_s6 + $0x74] ss:$8 sps:$4 sm:$0xff]  }
 0x868   :  { %v810_v57 = vpop.xlane.xlu0 %809 }
 0x869   :  { %3699 = vrcp.f32 %v810_v57 }
 0x86c   :  { %v813_v58 = vpop.xlane.xlu0 %812 }
 0x86d   :  { %3701 = vrcp.f32 %v813_v58 }
 0x870   :  { %v928_v1 = vpop.permute.xlu0 %927 }
 0x871   :  { %v933_v62 = vsel %vm367_vm1, %v928_v1, 0 }
 0x876   :  { %v3700_v59 = vpop.eup %3699 }
 0x877   :  { %v816_v60 = vmul.f32 %v3700_v59, %v3696_v43 }
 0x87a   :  { %v3702_v52 = vpop.eup %3701 }
 0x87b   :  { %v817_v61 = vmul.f32 %v3702_v52, %v3698_v45 }
 0x87d   :  { %v818_v35 = vpack.c.bf16 %v817_v61, %v816_v60 }
 0x87f   :  { %3324 = vmatmul.mubr.msk.bf16.vlgmr.msra.gmra.mxu1 %vm421_vm2, %v818_v35 }
 0x880   :  { %3336 = vmatpush3.bf16.xpose.msra.mxu1 %v933_v62  ;;  %3337 = vmatprep.mubr.msk.bf16.mxu1 %vm3848_vm0, %v3846_v0  ;;  %v3552_v62 = vld [vmem:[%s4555_s6 + $0x64] ss:$8 sps:$4 sm:$0xff]  }
 0x881   :  { %3347 = vmatprep.subr.bf16.mxu1 %v3846_v0 }
 0x887   :  { %3338 = vmatmul.mubr.msk.bf16.vlgmr.msra.gmra.mxu1 %vm367_vm1, %v926_v2  ;;  %v3550_v2 = vld [vmem:[%s4555_s6 + $0x60] ss:$8 sps:$4 sm:$0xff]  }
 0x888   :  { %3351 = vmatprep.mubr.msk.bf16.mxu1 %vm3848_vm0, %v3846_v0 }
 0x93f   :  { %v859_v3 = vpop.f32.mrf.mxu1 }
 0x941   :  { %v3325_v4 = vpop.f32.mrf.mxu1 }
 0x942   :  { %v3556_v4 = vld [vmem:[%s4555_s6 + $0x40] ss:$8 sps:$4 sm:$0xff]  }
 0x943   :  { %v862_v5 = vpop.f32.mrf.mxu1 }
 0x944   :  { %v866_v6 = vpack.c.bf16 %v862_v5, %v859_v3  ;;  %v3558_v3 = vld [vmem:[%s4555_s6 + $0x44] ss:$8 sps:$4 sm:$0xff]   ;;  %v3561_v5 = vld [vmem:[%s4555_s6 + $0x34] ss:$8 sps:$4 sm:$0xff]  }
 0x945   :  { %v3326_v7 = vpop.f32.mrf.mxu1 }
 0x946   :  { %3332 = vmatmul.mubr.msk.bf16.vlgmr.msra.gmra.mxu0 %vm367_vm1, %v866_v6  ;;  %v3559_v6 = vld [vmem:[%s4555_s6 + $0x30] ss:$8 sps:$4 sm:$0xff]   ;;  %v3564_v7 = vld [vmem:[%s4555_s6 + $0x24] ss:$8 sps:$4 sm:$0xff]  }
 0x947   :  { %v969_v8 = vpop.f32.mrf.mxu1  ;;  %3343 = vmatprep.mubr.msk.bf16.mxu0 %vm3848_vm0, %v3846_v0 }
 0x948   :  { %v976_v10 = vmul.f32 0.17677669, %v969_v8  ;;  %v3562_v8 = vld [vmem:[%s4555_s6 + $0x20] ss:$8 sps:$4 sm:$0xff]  }
 0x949   :  { %v3339_v11 = vpop.f32.mrf.mxu1 }
 0x94a   :  { %v981_v12 = vadd.f32 %v2985_v9, %v976_v10  ;;  %v3567_v9 = vld [vmem:[%s4555_s6 + $0x14] ss:$8 sps:$4 sm:$0xff]   ;;  %v3565_v10 = vld [vmem:[%s4555_s6 + $0x10] ss:$8 sps:$4 sm:$0xff]   ;;  %v3570_v11 = vld [vmem:[%s4555_s6 + $0x4] ss:$8 sps:$4 sm:$0xff]  }
 0x94b   :  { %v972_v13 = vpop.f32.mrf.mxu1 }
 0x94c   :  { %v977_v15 = vmul.f32 0.17677669, %v972_v13  ;;  %v983_v16 = vsel %vm421_vm2, %v981_v12, -inf }
 0x94d   :  { %984 = vmax.xlane.f32.xlu1 %v983_v16  ;;  %v3340_v17 = vpop.f32.mrf.mxu1 }
 0x94e   :  { %v982_v18 = vadd.f32 %v2986_v14, %v977_v15 }
 0x950   :  { %v986_v19 = vsel %vm421_vm2, %v982_v18, -inf }
 0x951   :  { %987 = vmax.xlane.f32.xlu0 %v986_v19 }
 0x9d6   :  { %v985_v20 = vpop.xlane.xlu1 %984 }
 0x9d7   :  { %v989_v21 = vsub.f32 %v981_v12, %v985_v20  ;;  %v3568_v12 = vld [vmem:[%s4555_s6] ss:$8 sps:$4 sm:$0xff]  }
 0x9d9   :  { %v991_v22 = vmul.f32 1.442695, %v989_v21 }
 0x9da   :  { %v988_v23 = vpop.xlane.xlu0 %987 }
 0x9db   :  { %3703 = vpow2.f32 %v991_v22  ;;  %v990_v24 = vsub.f32 %v982_v18, %v988_v23  ;;  %v2991_v22 = vld [vmem:[%s4552_s3] ss:$0 sm:$0xff] }
 0x9dd   :  { %v993_v25 = vmul.f32 1.442695, %v990_v24 }
 0x9df   :  { %3705 = vpow2.f32 %v993_v25 }
 0x9e8   :  { %v3704_v27 = vpop.eup %3703 }
 0x9e9   :  { %v995_v28 = vsel %vm421_vm2, %v3704_v27, 0.0 }
 0x9ea   :  { %996 = vadd.xlane.f32.xlu0 %v995_v28  ;;  %v3571_v28 = vld [vmem:[#allocation4 + $0x38] sm:$0xff]  }
 0x9ec   :  { %v3706_v29 = vpop.eup %3705 }
 0x9ed   :  { %v998_v30 = vsel %vm421_vm2, %v3706_v29, 0.0 }
 0x9ee   :  { %999 = vadd.xlane.f32.xlu1 %v998_v30  ;;  %v3573_v30 = vld [vmem:[#allocation4 + $0x28] sm:$0xff]  }
 0xa00   :  { %1006 = vrot.lane.b32.xlu0 %v4034_v55, %s3850_s29  ;;  %v3545_v55 = vld [vmem:[#allocation2 + $0x38] sm:$0xff]  }
 0xa01   :  { %3348 = vmatpush3.bf16.msra.mxu1 %v3545_v55 }
 0xa02   :  { %3349 = vmatprep.subr.bf16.mxu1 %v3846_v0 }
 0xa05   :  { %3350 = vmatpush3.bf16.msra.mxu1 %v3546_v54 }
 0xa06   :  { %v916_v31 = vpop.f32.mrf.mxu0  ;;  %3355 = vmatprep.subr.bf16.mxu1 %v3846_v0 }
 0xa07   :  { %v923_v32 = vadd.f32 %v916_v31, %v4122_v48  ;;  %v3574_v31 = vld [vmem:[#allocation4 + $0x20] sm:$0xff]  }
 0xa08   :  { %v3333_v33 = vpop.f32.mrf.mxu0 }
 0xa09   :  { %v3576_v33 = vld [vmem:[#allocation4 + $0x10] sm:$0xff]  }
 0xa0a   :  { %v919_v34 = vpop.f32.mrf.mxu0 }
 0xa0b   :  { %v924_v36 = vadd.f32 %v919_v34, %v4126_v53  ;;  %v3547_v53 = vld [vmem:[%s4555_s6 + $0x70] ss:$8 sps:$4 sm:$0xff]   ;;  %v3577_v34 = vld [vmem:[#allocation4 + $0x8] sm:$0xff]  }
 0xa0c   :  { %v3334_v38 = vpop.f32.mrf.mxu0 }
 0xa73   :  { %v997_v39 = vpop.xlane.xlu0 %996 }
 0xa74   :  { %3707 = vrcp.f32 %v997_v39 }
 0xa77   :  { %v1000_v40 = vpop.xlane.xlu1 %999  ;;  %v1007_v41 = vpop.permute.xlu0 %1006 }
 0xa78   :  { %3709 = vrcp.f32 %v1000_v40  ;;  %3342 = vmatpush3.bf16.msra.mxu0 %v1007_v41 }
 0xa79   :  { %1232 = vmatprep.subr.bf16.mxu0 %v3549_v56  ;;  %v3579_v56 = vld [vmem:[%s4553_s4 + $0x168] ss:$12 sps:$4 sm:$0xff]  }
 0xa81   :  { %v3708_v42 = vpop.eup %3707 }
 0xa82   :  { %v1003_v44 = vmul.f32 %v3708_v42, %v3704_v27 }
 0xa85   :  { %v3710_v43 = vpop.eup %3709 }
 0xa86   :  { %v1004_v45 = vmul.f32 %v3710_v43, %v3706_v29  ;;  %v3572_v29 = vld [vmem:[#allocation4 + $0x30] sm:$0xff]  }
 0xa88   :  { %v1005_v46 = vpack.c.bf16 %v1004_v45, %v1003_v44 }
 0xa8a   :  { %3344 = vmatmul.mubr.msk.bf16.vlgmr.msra.gmra.mxu0 %vm421_vm2, %v1005_v46 }
 0xa8b   :  { %1264 = vmatprep.mubr.bf16.mxu0 %v3847_v26  ;;  %1233 = vmatpush1.bf16.msra.mxu0 %v3547_v53 }
 0xa8c   :  { %1234 = vmatprep.subr.bf16.mxu0 %v3552_v62 }
 0xa8f   :  { %1235 = vmatpush1.bf16.msra.mxu0 %v3550_v2 }
 0xa90   :  { %1236 = vmatprep.subr.bf16.mxu0 %v3555_v37 }
 0xa93   :  { %1237 = vmatpush1.bf16.msra.mxu0 %v3553_v63 }
 0xa94   :  { %1238 = vmatprep.subr.bf16.mxu0 %v3558_v3  ;;  %v3585_v3 = vld [vmem:[%s4553_s4 + $0x154] ss:$12 sps:$4 sm:$0xff]  }
 0xa97   :  { %1239 = vmatpush1.bf16.msra.mxu0 %v3556_v4  ;;  %v3586_v4 = vld [vmem:[%s4553_s4 + $0x158] ss:$12 sps:$4 sm:$0xff]  }
 0xa98   :  { %1240 = vmatprep.subr.bf16.mxu0 %v3561_v5  ;;  %v3587_v5 = vld [vmem:[%s4553_s4 + $0x138] ss:$12 sps:$4 sm:$0xff]  }
 0xa9b   :  { %1241 = vmatpush1.bf16.msra.mxu0 %v3559_v6  ;;  %v3590_v6 = vld [vmem:[%s4553_s4 + $0x140] ss:$12 sps:$4 sm:$0xff]  }
 0xa9c   :  { %1242 = vmatprep.subr.bf16.mxu0 %v3564_v7  ;;  %v3593_v7 = vld [vmem:[%s4553_s4 + $0x124] ss:$12 sps:$4 sm:$0xff]  }
 0xa9f   :  { %1243 = vmatpush1.bf16.msra.mxu0 %v3562_v8  ;;  %v3591_v8 = vld [vmem:[%s4553_s4 + $0x120] ss:$12 sps:$4 sm:$0xff]  }
 0xaa0   :  { %1244 = vmatprep.subr.bf16.mxu0 %v3567_v9  ;;  %v3594_v9 = vld [vmem:[%s4553_s4 + $0x128] ss:$12 sps:$4 sm:$0xff]  }
 0xaa3   :  { %1245 = vmatpush1.bf16.msra.mxu0 %v3565_v10  ;;  %v3597_v10 = vld [vmem:[%s4553_s4 + $0x10c] ss:$12 sps:$4 sm:$0xff]  }
 0xaa4   :  { %1246 = vmatprep.subr.bf16.mxu0 %v3570_v11  ;;  %v3595_v11 = vld [vmem:[%s4553_s4 + $0x108] ss:$12 sps:$4 sm:$0xff]  }
 0xaa7   :  { %1247 = vmatpush1.bf16.msra.mxu0 %v3568_v12  ;;  %v3598_v12 = vld [vmem:[%s4553_s4 + $0x110] ss:$12 sps:$4 sm:$0xff]  }
 0xb4a   :  { %v1046_v47 = vpop.f32.mrf.mxu0 }
 0xb4c   :  { %v3345_v48 = vpop.f32.mrf.mxu0 }
 0xb4e   :  { %v1049_v49 = vpop.f32.mrf.mxu0 }
 0xb4f   :  { %v1053_v50 = vpack.c.bf16 %v1049_v49, %v1046_v47 }
 0xb50   :  { %v3346_v51 = vpop.f32.mrf.mxu0 }
 0xb51   :  { %3352 = vmatmul.mubr.msk.bf16.vlgmr.msra.gmra.mxu1 %vm367_vm1, %v1053_v50 }
 0xb52   :  { %3371 = vmatprep.mubr.msk.bf16.mxu1 %vm3848_vm0, %v3846_v0  ;;  %3356 = vmatpush3.bf16.msra.mxu1 %v3571_v28 }
 0xb53   :  { %3357 = vmatprep.subr.bf16.mxu1 %v3846_v0 }
 0xb56   :  { %3358 = vmatpush3.bf16.msra.mxu1 %v3572_v29 }
 0xb57   :  { %3359 = vmatprep.subr.bf16.mxu1 %v3846_v0 }
 0xb5a   :  { %3360 = vmatpush3.bf16.msra.mxu1 %v3573_v30 }
 0xb5b   :  { %3361 = vmatprep.subr.bf16.mxu1 %v3846_v0 }
 0xb5e   :  { %3362 = vmatpush3.bf16.msra.mxu1 %v3574_v31 }
 0xb5f   :  { %3363 = vmatprep.subr.bf16.mxu1 %v3846_v0 }
 0xc11   :  { %v1103_v57 = vpop.f32.mrf.mxu1 }
 0xc12   :  { %v4168_v58 = vadd.f32 %v1103_v57, %v923_v32  ;;  %v3575_v32 = vld [vmem:[#allocation4 + $0x18] sm:$0xff]  }
 0xc13   :  { %v3353_v59 = vpop.f32.mrf.mxu1  ;;  %3364 = vmatpush3.bf16.msra.mxu1 %v3575_v32  ;;  %v3581_v57 = vld [vmem:[%s4553_s4 + $0x16c] ss:$12 sps:$4 sm:$0xff]   ;;  %v3019_v32 = vld [vmem:[%s4551_s2 + $0x1] ss:$0 sm:$0xff] }
 0xc14   :  { %v1113_v52 = vmul.f32 %v4168_v58, %v4168_v58  ;;  %3365 = vmatprep.subr.bf16.mxu1 %v3846_v0  ;;  %v3582_v59 = vld [vmem:[%s4553_s4 + $0x170] ss:$12 sps:$4 sm:$0xff]   ;;  %1585 = vmatprep.subr.bf16.mxu0 %v3581_v57 }
 0xc15   :  { %v1106_v60 = vpop.f32.mrf.mxu1 }
 0xc16   :  { %v4172_v61 = vadd.f32 %v1106_v60, %v924_v36  ;;  %1115 = vadd.xlane.f32.xlu1 %v1113_v52  ;;  %v3578_v36 = vld [vmem:[#allocation4] sm:$0xff]  }
 0xc17   :  { %v3354_v1 = vpop.f32.mrf.mxu1  ;;  %3366 = vmatpush3.bf16.msra.mxu1 %v3576_v33 }
 0xc18   :  { %v1114_v35 = vmul.f32 %v4172_v61, %v4172_v61  ;;  %3367 = vmatprep.subr.bf16.mxu1 %v3846_v0 }
 0xc1a   :  { %1117 = vadd.xlane.f32.xlu1 %v1114_v35 }
 0xc1b   :  { %3368 = vmatpush3.bf16.msra.mxu1 %v3577_v34 }
 0xc1c   :  { %3369 = vmatprep.subr.bf16.mxu1 %v3846_v0 }
 0xc1f   :  { %3370 = vmatpush3.bf16.msra.mxu1 %v3578_v36 }
 0xc20   :  { %3375 = vmatprep.subr.bf16.mxu1 %v3846_v0 }
 0xc9f   :  { %v1116_v13 = vpop.xlane.xlu1 %1115 }
 0xca0   :  { %v1119_v14 = vmul.f32 0.0078125, %v1116_v13  ;;  %v3601_v13 = vld [vmem:[%s4553_s4 + $0xf4] ss:$12 sps:$4 sm:$0xff]  }
 0xca2   :  { %v1121_v15 = vadd.f32 1e-05, %v1119_v14  ;;  %v3599_v14 = vld [vmem:[%s4553_s4 + $0xf0] ss:$12 sps:$4 sm:$0xff]  }
 0xca3   :  { %v1118_v16 = vpop.xlane.xlu1 %1117 }
 0xca4   :  { %3711 = vrsqrt.f32 %v1121_v15  ;;  %v1120_v17 = vmul.f32 0.0078125, %v1118_v16  ;;  %v3602_v15 = vld [vmem:[%s4553_s4 + $0xf8] ss:$12 sps:$4 sm:$0xff]   ;;  %v3605_v16 = vld [vmem:[%s4553_s4 + $0xdc] ss:$12 sps:$4 sm:$0xff]  }
 0xca6   :  { %v1122_v18 = vadd.f32 1e-05, %v1120_v17  ;;  %v3603_v17 = vld [vmem:[%s4553_s4 + $0xd8] ss:$12 sps:$4 sm:$0xff]  }
 0xca8   :  { %3713 = vrsqrt.f32 %v1122_v18  ;;  %v3606_v18 = vld [vmem:[%s4553_s4 + $0xe0] ss:$12 sps:$4 sm:$0xff]  }
 0xcb1   :  { %v3712_v19 = vpop.eup %3711 }
 0xcb2   :  { %v1125_v20 = vmul.f32 %v3712_v19, %v4168_v58  ;;  %v3609_v19 = vld [vmem:[%s4553_s4 + $0xc4] ss:$12 sps:$4 sm:$0xff]  }
 0xcb4   :  { %v1133_v24 = vmul.f32 %v2991_v22, %v1125_v20  ;;  %v3607_v20 = vld [vmem:[%s4553_s4 + $0xc0] ss:$12 sps:$4 sm:$0xff]  }
 0xcb5   :  { %v3714_v21 = vpop.eup %3713 }
 0xcb6   :  { %v1126_v23 = vmul.f32 %v3714_v21, %v4172_v61  ;;  %v3610_v21 = vld [vmem:[%s4553_s4 + $0xc8] ss:$12 sps:$4 sm:$0xff]  }
 0xcb8   :  { %v1134_v25 = vmul.f32 %v2991_v22, %v1126_v23 }
 0xcba   :  { %v1135_v27 = vpack.c.bf16 %v1134_v25, %v1133_v24 }
 0xcbc   :  { %1265 = vmatmul.mubr.bf16.vlgmr.msra.gmra.mxu0 %v1135_v27 }
 0xcbd   :  { %1617 = vmatprep.mubr.bf16.mxu0 %v3847_v26  ;;  %1586 = vmatpush1.bf16.msra.mxu0 %v3579_v56 }
 0xcbe   :  { %1587 = vmatprep.subr.bf16.mxu0 %v3585_v3 }
 0xd7c   :  { %v1266_v38 = vpop.f32.mrf.mxu0 }
 0xd7d   :  { %v3008_v39 = vmul.f32 -1.442695, %v1266_v38 }
 0xd7e   :  { %v1268_v40 = vpop.f32.mrf.mxu0 }
 0xd7f   :  { %3715 = vpow2.f32 %v3008_v39 }
 0xd80   :  { %v1270_v41 = vpop.f32.mrf.mxu0 }
 0xd81   :  { %v3009_v42 = vmul.f32 -1.442695, %v1270_v41 }
 0xd82   :  { %v1272_v49 = vpop.f32.mrf.mxu0 }
 0xd83   :  { %3717 = vpow2.f32 %v3009_v42 }
 0xd8c   :  { %v3716_v43 = vpop.eup %3715 }
 0xd8d   :  { %v1281_v44 = vadd.f32 1.0, %v3716_v43 }
 0xd8f   :  { %3719 = vrcp.f32 %v1281_v44 }
 0xd90   :  { %v3718_v45 = vpop.eup %3717 }
 0xd91   :  { %v1282_v46 = vadd.f32 1.0, %v3718_v45 }
 0xd93   :  { %3721 = vrcp.f32 %v1282_v46 }
 0xd9c   :  { %v3720_v55 = vpop.eup %3719 }
 0xd9d   :  { %v1287_v54 = vmul.f32 %v3720_v55, %v1266_v38 }
 0xd9f   :  { %v1289_v50 = vmul.f32 %v1287_v54, %v1268_v40 }
 0xda0   :  { %v3722_v47 = vpop.eup %3721 }
 0xda1   :  { %v1288_v48 = vmul.f32 %v3722_v47, %v1270_v41 }
 0xda3   :  { %v1290_v51 = vmul.f32 %v1288_v48, %v1272_v49 }
 0xda5   :  { %v1291_v53 = vpack.c.bf16 %v1290_v51, %v1289_v50  ;;  %v1738_v50 = vld [vmem:[%s4550_s1] sm:$0xff] }
 0xda7   :  { %3372 = vmatmul.mubr.bf16.vlgmr.msra.gmra.mxu1 %v1291_v53 }
 0xda8   :  { %3391 = vmatprep.mubr.msk.bf16.mxu1 %vm3848_vm0, %v3846_v0  ;;  %3376 = vmatpush3.bf16.msra.mxu1 %v3582_v59  ;;  %v1739_v59 = vld [vmem:[%s4550_s1 + $0x8] sm:$0xff] }
 0xda9   :  { %3377 = vmatprep.subr.bf16.mxu1 %v3846_v0 }
 0xdac   :  { %3378 = vmatpush3.bf16.msra.mxu1 %v3586_v4 }
 0xdad   :  { %3379 = vmatprep.subr.bf16.mxu1 %v3846_v0 }
 0xdb0   :  { %3380 = vmatpush3.bf16.msra.mxu1 %v3590_v6 }
 0xdb1   :  { %3381 = vmatprep.subr.bf16.mxu1 %v3846_v0 }
 0xdb4   :  { %3382 = vmatpush3.bf16.msra.mxu1 %v3594_v9 }
 0xdb5   :  { %3383 = vmatprep.subr.bf16.mxu1 %v3846_v0 }
 0xdb8   :  { %3384 = vmatpush3.bf16.msra.mxu1 %v3598_v12 }
 0xdb9   :  { %3385 = vmatprep.subr.bf16.mxu1 %v3846_v0 }
 0xdbc   :  { %3386 = vmatpush3.bf16.msra.mxu1 %v3602_v15 }
 0xdbd   :  { %3387 = vmatprep.subr.bf16.mxu1 %v3846_v0 }
 0xdc0   :  { %3388 = vmatpush3.bf16.msra.mxu1 %v3606_v18 }
 0xdc1   :  { %3389 = vmatprep.subr.bf16.mxu1 %v3846_v0 }
 0xdc4   :  { %3390 = vmatpush3.bf16.msra.mxu1 %v3610_v21  ;;  %v3612_v21 = vld [vmem:[#allocation2 + $0x40] sm:$0xff]  }
 0xdc5   :  { %3401 = vmatprep.subr.bf16.mxu1 %v3846_v0 }
 0xe67   :  { %v1390_v52 = vpop.f32.mrf.mxu1 }
 0xe68   :  { %v4245_v60 = vadd.f32 %v1390_v52, %v4168_v58  ;;  %v3583_v58 = vld [vmem:[%s4553_s4 + $0x150] ss:$12 sps:$4 sm:$0xff]  }
 0xe69   :  { %v3373_v1 = vpop.f32.mrf.mxu1  ;;  %1588 = vmatpush1.bf16.msra.mxu0 %v3583_v58 }
 0xe6a   :  { %v1401_v35 = vmul.f32 %v4245_v60, %v4245_v60 }
 0xe6b   :  { %v1393_v62 = vpop.f32.mrf.mxu1 }
 0xe6c   :  { %v4250_v2 = vadd.f32 %v1393_v62, %v4172_v61  ;;  %1403 = vadd.xlane.f32.xlu1 %v1401_v35  ;;  %v3589_v61 = vld [vmem:[%s4553_s4 + $0x13c] ss:$12 sps:$4 sm:$0xff]  }
 0xe6d   :  { %v3374_v37 = vpop.f32.mrf.mxu1  ;;  %1589 = vmatprep.subr.bf16.mxu0 %v3589_v61 }
 0xe6e   :  { %v1402_v63 = vmul.f32 %v4250_v2, %v4250_v2  ;;  %1590 = vmatpush1.bf16.msra.mxu0 %v3587_v5 }
 0xe6f   :  { %1591 = vmatprep.subr.bf16.mxu0 %v3593_v7 }
 0xe70   :  { %1405 = vadd.xlane.f32.xlu1 %v1402_v63 }
 0xe72   :  { %1592 = vmatpush1.bf16.msra.mxu0 %v3591_v8 }
 0xe73   :  { %1593 = vmatprep.subr.bf16.mxu0 %v3597_v10 }
 0xe76   :  { %1594 = vmatpush1.bf16.msra.mxu0 %v3595_v11 }
 0xe77   :  { %1595 = vmatprep.subr.bf16.mxu0 %v3601_v13 }
 0xe7a   :  { %1596 = vmatpush1.bf16.msra.mxu0 %v3599_v14 }
 0xe7b   :  { %1597 = vmatprep.subr.bf16.mxu0 %v3605_v16 }
 0xe7e   :  { %1598 = vmatpush1.bf16.msra.mxu0 %v3603_v17 }
 0xe7f   :  { %1599 = vmatprep.subr.bf16.mxu0 %v3609_v19 }
 0xe82   :  { %1600 = vmatpush1.bf16.msra.mxu0 %v3607_v20  ;;  %v3611_v20 = vld [vmem:[#allocation2 + $0x48] sm:$0xff]  }
 0xe83   :  { %3395 = vmatprep.subr.bf16.mxu0 %v3846_v0 }
 0xef5   :  { %v1404_v22 = vpop.xlane.xlu1 %1403 }
 0xef6   :  { %v1407_v23 = vmul.f32 0.0078125, %v1404_v22 }
 0xef8   :  { %v1409_v24 = vadd.f32 1e-05, %v1407_v23 }
 0xef9   :  { %v1406_v25 = vpop.xlane.xlu1 %1405 }
 0xefa   :  { %3723 = vrsqrt.f32 %v1409_v24  ;;  %v1408_v27 = vmul.f32 0.0078125, %v1406_v25 }
 0xefc   :  { %v1410_v28 = vadd.f32 1e-05, %v1408_v27 }
 0xefe   :  { %3725 = vrsqrt.f32 %v1410_v28 }
 0xf07   :  { %v3724_v29 = vpop.eup %3723 }
 0xf08   :  { %v1413_v30 = vmul.f32 %v3724_v29, %v4245_v60  ;;  %v3082_v29 = vld [vmem:[%s4550_s1 + $0x10] sm:$0xff] }
 0xf0a   :  { %v1421_v34 = vmul.f32 %v3019_v32, %v1413_v30 }
 0xf0b   :  { %v3726_v31 = vpop.eup %3725 }
 0xf0c   :  { %v1414_v33 = vmul.f32 %v3726_v31, %v4250_v2 }
 0xf0e   :  { %v1422_v36 = vmul.f32 %v3019_v32, %v1414_v33 }
 0xf10   :  { %v1423_v38 = vpack.c.bf16 %v1422_v36, %v1421_v34  ;;  %v3083_v34 = vld [vmem:[%s4550_s1 + $0x18] sm:$0xff] }
 0xf12   :  { %1618 = vmatmul.mubr.bf16.vlgmr.msra.gmra.mxu0 %v1423_v38  ;;  %3392 = vmatmul.mubr.bf16.vlgmr.msra.gmra.mxu1 %v1423_v38 }
 0xf13   :  { %3397 = vmatprep.mubr.msk.bf16.mxu0 %vm3848_vm0, %v3846_v0  ;;  %3403 = vmatprep.mubr.msk.bf16.mxu1 %vm3848_vm0, %v3846_v0 }
 0xfd2   :  { %v1619_v39 = vpop.f32.mrf.mxu0  ;;  %v1662_v40 = vpop.f32.mrf.mxu1 }
 0xfd4   :  { %v1621_v41 = vpop.f32.mrf.mxu0  ;;  %v3393_v42 = vpop.f32.mrf.mxu1 }
 0xfd6   :  { %v1623_v43 = vpop.f32.mrf.mxu0  ;;  %v1665_v44 = vpop.f32.mrf.mxu1 }
 0xfd7   :  { %v4334_v45 = vpack.c.bf16 %v1665_v44, %v1662_v40  ;;  %v4343_v48 = vpack.c.bf16 %v1623_v43, %v1619_v39 }
 0xfd8   :  { %v1625_v46 = vpop.f32.mrf.mxu0  ;;  %v3394_v55 = vpop.f32.mrf.mxu1 }
 0xfd9   :  { %v4336_v54 = vpack.c.bf16 %v1625_v46, %v1621_v41  ;;  %3402 = vmatpush3.bf16.msra.mxu1 %v4334_v45 }
 0xfda   :  { %3415 = vmatprep.subr.bf16.mxu1 %v3846_v0 }
 0xfdb   :  { %v1693_v47 = vsel %vm367_vm1, %v4336_v54, 0 }
 0xfdc   :  { %3396 = vmatpush3.bf16.xpose.msra.mxu0 %v1693_v47 }
 0xfdd   :  { %3407 = vmatprep.subr.bf16.mxu0 %v3846_v0 }
 0xfe3   :  { %3398 = vmatmul.mubr.msk.bf16.vlgmr.msra.gmra.mxu0 %vm367_vm1, %v4343_v48 }
 0xfe4   :  { %3411 = vmatprep.mubr.msk.bf16.mxu0 %vm3848_vm0, %v3846_v0  ;;  %3408 = vmatpush3.bf16.msra.mxu0 %v3611_v20  ;;  %v3090_v20 = vld [vmem:[%s4550_s1 + $0x28] sm:$0xff] }
 0xfe5   :  { %3409 = vmatprep.subr.bf16.mxu0 %v3846_v0 }
 0xfe8   :  { %3410 = vmatpush3.bf16.msra.mxu0 %v3612_v21 }
 0xfe9   :  { %3421 = vmatprep.subr.bf16.mxu0 %v3846_v0 }
0x10a3   :  { %v1729_v49 = vpop.f32.mrf.mxu0 }
0x10a4   :  { %v1736_v51 = vmul.f32 0.17677669, %v1729_v49 }
0x10a5   :  { %v3399_v53 = vpop.f32.mrf.mxu0 }
0x10a6   :  { %v1740_v56 = vadd.f32 %v1738_v50, %v1736_v51 }
0x10a7   :  { %v1732_v57 = vpop.f32.mrf.mxu0 }
0x10a8   :  { %v1737_v52 = vmul.f32 0.17677669, %v1732_v57  ;;  %v1742_v1 = vsel %vm421_vm2, %v1740_v56, -inf }
0x10a9   :  { %1743 = vmax.xlane.f32.xlu1 %v1742_v1  ;;  %v3400_v35 = vpop.f32.mrf.mxu0 }
0x10aa   :  { %v1741_v62 = vadd.f32 %v1739_v59, %v1737_v52 }
0x10ac   :  { %v1745_v37 = vsel %vm421_vm2, %v1741_v62, -inf }
0x10ad   :  { %1746 = vmax.xlane.f32.xlu1 %v1745_v37 }
0x1132   :  { %v1744_v63 = vpop.xlane.xlu1 %1743 }
0x1133   :  { %v1748_v3 = vsub.f32 %v1740_v56, %v1744_v63 }
0x1135   :  { %v1750_v58 = vmul.f32 1.442695, %v1748_v3 }
0x1136   :  { %v1747_v4 = vpop.xlane.xlu1 %1746 }
0x1137   :  { %3727 = vpow2.f32 %v1750_v58  ;;  %v1749_v61 = vsub.f32 %v1741_v62, %v1747_v4 }
0x1139   :  { %v1752_v5 = vmul.f32 1.442695, %v1749_v61 }
0x113b   :  { %3729 = vpow2.f32 %v1752_v5 }
0x1144   :  { %v3728_v6 = vpop.eup %3727 }
0x1145   :  { %v1754_v7 = vsel %vm421_vm2, %v3728_v6, 0.0 }
0x1146   :  { %1755 = vadd.xlane.f32.xlu0 %v1754_v7  ;;  %v3613_v7 = vld [vmem:[#allocation2 + $0x58] sm:$0xff]  }
0x1148   :  { %v3730_v8 = vpop.eup %3729 }
0x1149   :  { %v1757_v9 = vsel %vm421_vm2, %v3730_v8, 0.0 }
0x114a   :  { %1758 = vadd.xlane.f32.xlu1 %v1757_v9 }
0x115b   :  { %1872 = vrot.lane.b32.xlu1 %v4336_v54, %s3849_s21 }
0x115f   :  { %1869 = vrot.lane.b32.xlu1 %v4343_v48, %s3849_s21 }
0x11cf   :  { %v1756_v10 = vpop.xlane.xlu0 %1755 }
0x11d0   :  { %3731 = vrcp.f32 %v1756_v10 }
0x11d3   :  { %v1759_v11 = vpop.xlane.xlu1 %1758 }
0x11d4   :  { %3733 = vrcp.f32 %v1759_v11 }
0x11d7   :  { %v1873_v16 = vpop.permute.xlu1 %1872 }
0x11d8   :  { %v1878_v18 = vsel %vm367_vm1, %v1873_v16, 0 }
0x11db   :  { %v1870_v19 = vpop.permute.xlu1 %1869 }
0x11dd   :  { %v3732_v12 = vpop.eup %3731 }
0x11de   :  { %v1762_v14 = vmul.f32 %v3732_v12, %v3728_v6 }
0x11e1   :  { %v3734_v13 = vpop.eup %3733 }
0x11e2   :  { %v1763_v15 = vmul.f32 %v3734_v13, %v3730_v8  ;;  %v3614_v8 = vld [vmem:[#allocation2 + $0x50] sm:$0xff]  }
0x11e4   :  { %v1764_v17 = vpack.c.bf16 %v1763_v15, %v1762_v14  ;;  %v3089_v15 = vld [vmem:[%s4550_s1 + $0x20] sm:$0xff] }
0x11e6   :  { %3404 = vmatmul.mubr.msk.bf16.vlgmr.msra.gmra.mxu1 %vm421_vm2, %v1764_v17 }
0x11e7   :  { %3416 = vmatpush3.bf16.xpose.msra.mxu1 %v1878_v18  ;;  %3417 = vmatprep.mubr.msk.bf16.mxu1 %vm3848_vm0, %v3846_v0 }
0x11e8   :  { %3427 = vmatprep.subr.bf16.mxu1 %v3846_v0 }
0x11ee   :  { %3418 = vmatmul.mubr.msk.bf16.vlgmr.msra.gmra.mxu1 %vm367_vm1, %v1870_v19 }
0x11ef   :  { %3431 = vmatprep.mubr.msk.bf16.mxu1 %vm3848_vm0, %v3846_v0  ;;  %3428 = vmatpush3.bf16.msra.mxu1 %v3613_v7  ;;  %v3097_v7 = vld [vmem:[%s4550_s1 + $0x38] sm:$0xff] }
0x11f0   :  { %3429 = vmatprep.subr.bf16.mxu1 %v3846_v0 }
0x11f3   :  { %3430 = vmatpush3.bf16.msra.mxu1 %v3614_v8 }
0x11f4   :  { %3441 = vmatprep.subr.bf16.mxu1 %v3846_v0 }
0x12a6   :  { %v1802_v22 = vpop.f32.mrf.mxu1 }
0x12a8   :  { %v3405_v23 = vpop.f32.mrf.mxu1 }
0x12aa   :  { %v1805_v24 = vpop.f32.mrf.mxu1 }
0x12ab   :  { %v1809_v25 = vpack.c.bf16 %v1805_v24, %v1802_v22 }
0x12ac   :  { %v3406_v27 = vpop.f32.mrf.mxu1 }
0x12ad   :  { %3412 = vmatmul.mubr.msk.bf16.vlgmr.msra.gmra.mxu0 %vm367_vm1, %v1809_v25 }
0x12ae   :  { %v1914_v28 = vpop.f32.mrf.mxu1  ;;  %3423 = vmatprep.mubr.msk.bf16.mxu0 %vm3848_vm0, %v3846_v0 }
0x12af   :  { %v1921_v30 = vmul.f32 0.17677669, %v1914_v28 }
0x12b0   :  { %v3419_v31 = vpop.f32.mrf.mxu1 }
0x12b1   :  { %v1925_v32 = vadd.f32 %v3082_v29, %v1921_v30 }
0x12b2   :  { %v1917_v33 = vpop.f32.mrf.mxu1 }
0x12b3   :  { %v1922_v36 = vmul.f32 0.17677669, %v1917_v33  ;;  %v1927_v38 = vsel %vm421_vm2, %v1925_v32, -inf }
0x12b4   :  { %1928 = vmax.xlane.f32.xlu1 %v1927_v38  ;;  %v3420_v39 = vpop.f32.mrf.mxu1 }
0x12b5   :  { %v1926_v40 = vadd.f32 %v3083_v34, %v1922_v36 }
0x12b7   :  { %v1930_v41 = vsel %vm421_vm2, %v1926_v40, -inf }
0x12b8   :  { %1931 = vmax.xlane.f32.xlu0 %v1930_v41 }
0x12c5   :  { %2059 = vrot.lane.b32.xlu1 %v4336_v54, %s3841_s18 }
0x133d   :  { %v1929_v42 = vpop.xlane.xlu1 %1928 }
0x133e   :  { %v1933_v43 = vsub.f32 %v1925_v32, %v1929_v42 }
0x1340   :  { %v1935_v44 = vmul.f32 1.442695, %v1933_v43 }
0x1341   :  { %v1932_v46 = vpop.xlane.xlu0 %1931  ;;  %v2060_v4 = vpop.permute.xlu1 %2059 }
0x1342   :  { %3735 = vpow2.f32 %v1935_v44  ;;  %v1934_v55 = vsub.f32 %v1926_v40, %v1932_v46  ;;  %v2065_v5 = vsel %vm367_vm1, %v2060_v4, 0 }
0x1344   :  { %v1937_v47 = vmul.f32 1.442695, %v1934_v55 }
0x1346   :  { %3737 = vpow2.f32 %v1937_v47 }
0x134f   :  { %v3736_v49 = vpop.eup %3735 }
0x1350   :  { %v1939_v50 = vsel %vm421_vm2, %v3736_v49, 0.0 }
0x1351   :  { %1940 = vadd.xlane.f32.xlu0 %v1939_v50 }
0x1353   :  { %v3738_v51 = vpop.eup %3737 }
0x1354   :  { %v1942_v53 = vsel %vm421_vm2, %v3738_v51, 0.0 }
0x1355   :  { %1943 = vadd.xlane.f32.xlu0 %v1942_v53 }
0x136b   :  { %1951 = vrot.lane.b32.xlu0 %v4334_v45, %s3849_s21 }
0x136d   :  { %v4390_v56 = vpop.f32.mrf.mxu0 }
0x136f   :  { %v3413_v57 = vpop.f32.mrf.mxu0  ;;  %2057 = vrot.lane.b32.xlu0 %v4343_v48, %s3841_s18 }
0x1371   :  { %v4394_v59 = vpop.f32.mrf.mxu0 }
0x1372   :  { %v1867_v42 = vadd.f32 %v4394_v59, %v4250_v2  ;;  %v3615_v59 = vld [vmem:[#allocation2 + $0x68] sm:$0xff]  }
0x1373   :  { %v3414_v52 = vpop.f32.mrf.mxu0 }
0x1374   :  { %v3616_v52 = vld [vmem:[#allocation2 + $0x60] sm:$0xff]  }
0x13da   :  { %v1941_v1 = vpop.xlane.xlu0 %1940 }
0x13db   :  { %3739 = vrcp.f32 %v1941_v1 }
0x13de   :  { %v1944_v35 = vpop.xlane.xlu0 %1943 }
0x13df   :  { %3741 = vrcp.f32 %v1944_v35 }
0x13e2   :  { %v1952_v62 = vpop.permute.xlu0 %1951 }
0x13e3   :  { %3422 = vmatpush3.bf16.msra.mxu0 %v1952_v62 }
0x13e4   :  { %3435 = vmatprep.subr.bf16.mxu0 %v3846_v0 }
0x13e6   :  { %v2058_v6 = vpop.permute.xlu0 %2057 }
0x13e8   :  { %v3740_v37 = vpop.eup %3739 }
0x13e9   :  { %v1947_v3 = vmul.f32 %v3740_v37, %v3736_v49 }
0x13ec   :  { %v3742_v63 = vpop.eup %3741 }
0x13ed   :  { %v1948_v58 = vmul.f32 %v3742_v63, %v3738_v51 }
0x13ef   :  { %v1949_v61 = vpack.c.bf16 %v1948_v58, %v1947_v3  ;;  %v3096_v58 = vld [vmem:[%s4550_s1 + $0x30] sm:$0xff] }
0x13f1   :  { %3424 = vmatmul.mubr.msk.bf16.vlgmr.msra.gmra.mxu0 %vm421_vm2, %v1949_v61 }
0x13f2   :  { %3436 = vmatpush3.bf16.xpose.msra.mxu0 %v2065_v5  ;;  %3437 = vmatprep.mubr.msk.bf16.mxu0 %vm3848_vm0, %v3846_v0 }
0x13f3   :  { %3447 = vmatprep.subr.bf16.mxu0 %v3846_v0 }
0x13f9   :  { %3438 = vmatmul.mubr.msk.bf16.vlgmr.msra.gmra.mxu0 %vm367_vm1, %v2058_v6 }
0x13fa   :  { %3451 = vmatprep.mubr.msk.bf16.mxu0 %vm3848_vm0, %v3846_v0  ;;  %3448 = vmatpush3.bf16.msra.mxu0 %v3615_v59  ;;  %v3627_v59 = vld [vmem:[%s4555_s6 + $0xd4] ss:$8 sps:$4 sm:$0xff]  }
0x13fb   :  { %3449 = vmatprep.subr.bf16.mxu0 %v3846_v0 }
0x13fe   :  { %3450 = vmatpush3.bf16.msra.mxu0 %v3616_v52  ;;  %v3625_v52 = vld [vmem:[%s4555_s6 + $0xd0] ss:$8 sps:$4 sm:$0xff]  }
0x13ff   :  { %3461 = vmatprep.subr.bf16.mxu0 %v3846_v0 }
0x14b1   :  { %v1991_v9 = vpop.f32.mrf.mxu0 }
0x14b3   :  { %v3425_v10 = vpop.f32.mrf.mxu0 }
0x14b5   :  { %v1994_v11 = vpop.f32.mrf.mxu0 }
0x14b6   :  { %v1998_v12 = vpack.c.bf16 %v1994_v11, %v1991_v9 }
0x14b7   :  { %v3426_v13 = vpop.f32.mrf.mxu0 }
0x14b8   :  { %3432 = vmatmul.mubr.msk.bf16.vlgmr.msra.gmra.mxu1 %vm367_vm1, %v1998_v12 }
0x14b9   :  { %v2101_v14 = vpop.f32.mrf.mxu0  ;;  %3443 = vmatprep.mubr.msk.bf16.mxu1 %vm3848_vm0, %v3846_v0 }
0x14ba   :  { %v2108_v16 = vmul.f32 0.17677669, %v2101_v14 }
0x14bb   :  { %v3439_v17 = vpop.f32.mrf.mxu0 }
0x14bc   :  { %v2112_v18 = vadd.f32 %v3089_v15, %v2108_v16 }
0x14bd   :  { %v2104_v19 = vpop.f32.mrf.mxu0 }
0x14be   :  { %v2109_v21 = vmul.f32 0.17677669, %v2104_v19  ;;  %v2114_v22 = vsel %vm421_vm2, %v2112_v18, -inf }
0x14bf   :  { %2115 = vmax.xlane.f32.xlu0 %v2114_v22  ;;  %v3440_v23 = vpop.f32.mrf.mxu0 }
0x14c0   :  { %v2113_v24 = vadd.f32 %v3090_v20, %v2109_v21 }
0x14c2   :  { %v2117_v25 = vsel %vm421_vm2, %v2113_v24, -inf }
0x14c3   :  { %2118 = vmax.xlane.f32.xlu1 %v2117_v25 }
0x14d4   :  { %2245 = vrot.lane.b32.xlu1 %v4336_v54, %s3850_s29  ;;  %v1866_v54 = vadd.f32 %v4390_v56, %v4245_v60 }
0x1548   :  { %v2116_v27 = vpop.xlane.xlu0 %2115 }
0x1549   :  { %v2120_v28 = vsub.f32 %v2112_v18, %v2116_v27 }
0x154b   :  { %v2122_v29 = vmul.f32 1.442695, %v2120_v28 }
0x154c   :  { %v2119_v30 = vpop.xlane.xlu1 %2118 }
0x154d   :  { %3743 = vpow2.f32 %v2122_v29  ;;  %v2121_v31 = vsub.f32 %v2113_v24, %v2119_v30 }
0x154f   :  { %v2124_v32 = vmul.f32 1.442695, %v2121_v31 }
0x1550   :  { %v2246_v53 = vpop.permute.xlu1 %2245 }
0x1551   :  { %3745 = vpow2.f32 %v2124_v32  ;;  %v2251_v2 = vsel %vm367_vm1, %v2246_v53, 0 }
0x155a   :  { %v3744_v33 = vpop.eup %3743 }
0x155b   :  { %v2126_v34 = vsel %vm421_vm2, %v3744_v33, 0.0 }
0x155c   :  { %2127 = vadd.xlane.f32.xlu0 %v2126_v34 }
0x155e   :  { %v3746_v36 = vpop.eup %3745 }
0x155f   :  { %v2129_v38 = vsel %vm421_vm2, %v3746_v36, 0.0 }
0x1560   :  { %2130 = vadd.xlane.f32.xlu0 %v2129_v38 }
0x1576   :  { %2137 = vrot.lane.b32.xlu0 %v4334_v45, %s3841_s18 }
0x1578   :  { %v2048_v39 = vpop.f32.mrf.mxu1 }
0x1579   :  { %v4426_v40 = vadd.f32 %v2048_v39, %v1866_v54  ;;  %v3617_v54 = vld [vmem:[#allocation2 + $0x78] sm:$0xff]   ;;  %v3618_v39 = vld [vmem:[#allocation2 + $0x70] sm:$0xff]  }
0x157a   :  { %2243 = vrot.lane.b32.xlu0 %v4343_v48, %s3850_s29  ;;  %v3433_v41 = vpop.f32.mrf.mxu1 }
0x157c   :  { %v2051_v43 = vpop.f32.mrf.mxu1 }
0x157d   :  { %v4432_v44 = vadd.f32 %v2051_v43, %v1867_v42 }
0x157e   :  { %v3434_v46 = vpop.f32.mrf.mxu1 }
0x157f   :  { %v3619_v46 = vld [vmem:[%s4555_s6 + $0xf0] ss:$8 sps:$4 sm:$0xff]  }
0x15e5   :  { %v2128_v55 = vpop.xlane.xlu0 %2127 }
0x15e6   :  { %3747 = vrcp.f32 %v2128_v55  ;;  %v3621_v55 = vld [vmem:[%s4555_s6 + $0xf4] ss:$8 sps:$4 sm:$0xff]  }
0x15e9   :  { %v2131_v47 = vpop.xlane.xlu0 %2130 }
0x15ea   :  { %3749 = vrcp.f32 %v2131_v47 }
0x15ed   :  { %v2138_v49 = vpop.permute.xlu0 %2137 }
0x15ee   :  { %3442 = vmatpush3.bf16.msra.mxu1 %v2138_v49 }
0x15ef   :  { %3455 = vmatprep.subr.bf16.mxu1 %v3846_v0 }
0x15f1   :  { %v2244_v57 = vpop.permute.xlu0 %2243 }
0x15f3   :  { %v3748_v60 = vpop.eup %3747 }
0x15f4   :  { %v2134_v51 = vmul.f32 %v3748_v60, %v3744_v33 }
0x15f7   :  { %v3750_v50 = vpop.eup %3749 }
0x15f8   :  { %v2135_v48 = vmul.f32 %v3750_v50, %v3746_v36 }
0x15fa   :  { %v2136_v56 = vpack.c.bf16 %v2135_v48, %v2134_v51 }
0x15fc   :  { %3444 = vmatmul.mubr.msk.bf16.vlgmr.msra.gmra.mxu1 %vm421_vm2, %v2136_v56 }
0x15fd   :  { %3456 = vmatpush3.bf16.xpose.msra.mxu1 %v2251_v2  ;;  %3457 = vmatprep.mubr.msk.bf16.mxu1 %vm3848_vm0, %v3846_v0  ;;  %v3624_v2 = vld [vmem:[%s4555_s6 + $0xe4] ss:$8 sps:$4 sm:$0xff]  }
0x15fe   :  { %3467 = vmatprep.subr.bf16.mxu1 %v3846_v0 }
0x1604   :  { %3458 = vmatmul.mubr.msk.bf16.vlgmr.msra.gmra.mxu1 %vm367_vm1, %v2244_v57  ;;  %v3622_v57 = vld [vmem:[%s4555_s6 + $0xe0] ss:$8 sps:$4 sm:$0xff]  }
0x1605   :  { %3471 = vmatprep.mubr.msk.bf16.mxu1 %vm3848_vm0, %v3846_v0  ;;  %3468 = vmatpush3.bf16.msra.mxu1 %v3617_v54 }
0x1606   :  { %3469 = vmatprep.subr.bf16.mxu1 %v3846_v0 }
0x1609   :  { %3470 = vmatpush3.bf16.msra.mxu1 %v3618_v39 }
0x160a   :  { %3475 = vmatprep.subr.bf16.mxu1 %v3846_v0 }
0x16bc   :  { %v2177_v1 = vpop.f32.mrf.mxu1 }
0x16be   :  { %v3445_v35 = vpop.f32.mrf.mxu1 }
0x16bf   :  { %v3628_v35 = vld [vmem:[%s4555_s6 + $0xc0] ss:$8 sps:$4 sm:$0xff]  }
0x16c0   :  { %v2180_v62 = vpop.f32.mrf.mxu1 }
0x16c1   :  { %v2184_v37 = vpack.c.bf16 %v2180_v62, %v2177_v1  ;;  %v3630_v1 = vld [vmem:[%s4555_s6 + $0xc4] ss:$8 sps:$4 sm:$0xff]   ;;  %v3633_v62 = vld [vmem:[%s4555_s6 + $0xb4] ss:$8 sps:$4 sm:$0xff]  }
0x16c2   :  { %v3446_v63 = vpop.f32.mrf.mxu1 }
0x16c3   :  { %3452 = vmatmul.mubr.msk.bf16.vlgmr.msra.gmra.mxu0 %vm367_vm1, %v2184_v37  ;;  %v3631_v37 = vld [vmem:[%s4555_s6 + $0xb0] ss:$8 sps:$4 sm:$0xff]   ;;  %v3636_v63 = vld [vmem:[%s4555_s6 + $0xa4] ss:$8 sps:$4 sm:$0xff]  }
0x16c4   :  { %v2287_v3 = vpop.f32.mrf.mxu1  ;;  %3463 = vmatprep.mubr.msk.bf16.mxu0 %vm3848_vm0, %v3846_v0 }
0x16c5   :  { %v2294_v4 = vmul.f32 0.17677669, %v2287_v3  ;;  %v3634_v3 = vld [vmem:[%s4555_s6 + $0xa0] ss:$8 sps:$4 sm:$0xff]  }
0x16c6   :  { %v3459_v61 = vpop.f32.mrf.mxu1 }
0x16c7   :  { %v2298_v5 = vadd.f32 %v3096_v58, %v2294_v4  ;;  %v3639_v58 = vld [vmem:[%s4555_s6 + $0x94] ss:$8 sps:$4 sm:$0xff]   ;;  %v3637_v4 = vld [vmem:[%s4555_s6 + $0x90] ss:$8 sps:$4 sm:$0xff]   ;;  %v3642_v61 = vld [vmem:[%s4555_s6 + $0x84] ss:$8 sps:$4 sm:$0xff]  }
0x16c8   :  { %v2290_v6 = vpop.f32.mrf.mxu1 }
0x16c9   :  { %v2295_v8 = vmul.f32 0.17677669, %v2290_v6  ;;  %v2300_v9 = vsel %vm421_vm2, %v2298_v5, -inf }
0x16ca   :  { %2301 = vmax.xlane.f32.xlu1 %v2300_v9  ;;  %v3460_v10 = vpop.f32.mrf.mxu1 }
0x16cb   :  { %v2299_v11 = vadd.f32 %v3097_v7, %v2295_v8 }
0x16cd   :  { %v2303_v12 = vsel %vm421_vm2, %v2299_v11, -inf }
0x16ce   :  { %2304 = vmax.xlane.f32.xlu0 %v2303_v12 }
0x16db   :  { %2323 = vrot.lane.b32.xlu1 %v4334_v45, %s3850_s29 }
0x1753   :  { %v2302_v13 = vpop.xlane.xlu1 %2301 }
0x1754   :  { %v2306_v14 = vsub.f32 %v2298_v5, %v2302_v13  ;;  %v3640_v5 = vld [vmem:[%s4555_s6 + $0x80] ss:$8 sps:$4 sm:$0xff]  }
0x1756   :  { %v2308_v15 = vmul.f32 1.442695, %v2306_v14 }
0x1757   :  { %v2324_v16 = vpop.permute.xlu1 %2323  ;;  %v2305_v17 = vpop.xlane.xlu0 %2304 }
0x1758   :  { %3751 = vpow2.f32 %v2308_v15  ;;  %v2307_v18 = vsub.f32 %v2299_v11, %v2305_v17  ;;  %3462 = vmatpush3.bf16.msra.mxu0 %v2324_v16  ;;  %v3103_v15 = vld [vmem:[%s4552_s3 + $0x1] ss:$0 sm:$0xff] }
0x1759   :  { %2551 = vmatprep.subr.bf16.mxu0 %v3621_v55 }
0x175a   :  { %v2310_v19 = vmul.f32 1.442695, %v2307_v18 }
0x175c   :  { %3753 = vpow2.f32 %v2310_v19 }
0x1765   :  { %v3752_v20 = vpop.eup %3751 }
0x1766   :  { %v2312_v21 = vsel %vm421_vm2, %v3752_v20, 0.0 }
0x1767   :  { %2313 = vadd.xlane.f32.xlu0 %v2312_v21  ;;  %v3644_v21 = vld [vmem:[#allocation4 + $0x70] sm:$0xff]  }
0x1769   :  { %v3754_v22 = vpop.eup %3753 }
0x176a   :  { %v2315_v23 = vsel %vm421_vm2, %v3754_v22, 0.0 }
0x176b   :  { %2316 = vadd.xlane.f32.xlu0 %v2315_v23  ;;  %v3646_v23 = vld [vmem:[#allocation4 + $0x60] sm:$0xff]  }
0x1783   :  { %v2234_v24 = vpop.f32.mrf.mxu0 }
0x1784   :  { %v2241_v45 = vadd.f32 %v2234_v24, %v4426_v40  ;;  %v3647_v24 = vld [vmem:[#allocation4 + $0x58] sm:$0xff]  }
0x1785   :  { %v3453_v25 = vpop.f32.mrf.mxu0 }
0x1786   :  { %v3650_v25 = vld [vmem:[#allocation4 + $0x40] sm:$0xff]  }
0x1787   :  { %v2237_v27 = vpop.f32.mrf.mxu0 }
0x1788   :  { %v2242_v28 = vadd.f32 %v2237_v27, %v4432_v44 }
0x1789   :  { %v3454_v29 = vpop.f32.mrf.mxu0 }
0x17f0   :  { %v2314_v30 = vpop.xlane.xlu0 %2313 }
0x17f1   :  { %3755 = vrcp.f32 %v2314_v30 }
0x17f4   :  { %v2317_v31 = vpop.xlane.xlu0 %2316 }
0x17f5   :  { %3757 = vrcp.f32 %v2317_v31 }
0x17fe   :  { %v3756_v32 = vpop.eup %3755 }
0x17ff   :  { %v2320_v34 = vmul.f32 %v3756_v32, %v3752_v20  ;;  %v3643_v20 = vld [vmem:[#allocation4 + $0x78] sm:$0xff]  }
0x1802   :  { %v3758_v33 = vpop.eup %3757 }
0x1803   :  { %v2321_v36 = vmul.f32 %v3758_v33, %v3754_v22  ;;  %v3645_v22 = vld [vmem:[#allocation4 + $0x68] sm:$0xff]  }
0x1805   :  { %v2322_v38 = vpack.c.bf16 %v2321_v36, %v2320_v34 }
0x1807   :  { %3464 = vmatmul.mubr.msk.bf16.vlgmr.msra.gmra.mxu0 %vm421_vm2, %v2322_v38 }
0x1808   :  { %2583 = vmatprep.mubr.bf16.mxu0 %v3847_v26  ;;  %2552 = vmatpush1.bf16.msra.mxu0 %v3619_v46  ;;  %v3653_v46 = vld [vmem:[#allocation6 + $0x74] ss:$8 sps:$4 sm:$0xff]  }
0x1809   :  { %2553 = vmatprep.subr.bf16.mxu0 %v3624_v2 }
0x180c   :  { %2554 = vmatpush1.bf16.msra.mxu0 %v3622_v57  ;;  %v3656_v57 = vld [vmem:[#allocation6 + $0x64] ss:$8 sps:$4 sm:$0xff]  }
0x180d   :  { %2555 = vmatprep.subr.bf16.mxu0 %v3627_v59  ;;  %v3654_v59 = vld [vmem:[#allocation6 + $0x60] ss:$8 sps:$4 sm:$0xff]  }
0x1810   :  { %2556 = vmatpush1.bf16.msra.mxu0 %v3625_v52  ;;  %v3659_v52 = vld [vmem:[#allocation6 + $0x54] ss:$8 sps:$4 sm:$0xff]  }
0x1811   :  { %2557 = vmatprep.subr.bf16.mxu0 %v3630_v1  ;;  %v3657_v1 = vld [vmem:[#allocation6 + $0x50] ss:$8 sps:$4 sm:$0xff]  }
0x1814   :  { %2558 = vmatpush1.bf16.msra.mxu0 %v3628_v35  ;;  %v3662_v35 = vld [vmem:[#allocation6 + $0x44] ss:$8 sps:$4 sm:$0xff]  }
0x1815   :  { %2559 = vmatprep.subr.bf16.mxu0 %v3633_v62  ;;  %v3660_v62 = vld [vmem:[#allocation6 + $0x40] ss:$8 sps:$4 sm:$0xff]  }
0x1818   :  { %2560 = vmatpush1.bf16.msra.mxu0 %v3631_v37  ;;  %v3663_v37 = vld [vmem:[#allocation6 + $0x30] ss:$8 sps:$4 sm:$0xff]  }
0x1819   :  { %2561 = vmatprep.subr.bf16.mxu0 %v3636_v63  ;;  %v3666_v63 = vld [vmem:[#allocation6 + $0x20] ss:$8 sps:$4 sm:$0xff]  }
0x181c   :  { %2562 = vmatpush1.bf16.msra.mxu0 %v3634_v3  ;;  %v3671_v3 = vld [vmem:[#allocation6 + $0x14] ss:$8 sps:$4 sm:$0xff]  }
0x181d   :  { %2563 = vmatprep.subr.bf16.mxu0 %v3639_v58  ;;  %v3669_v58 = vld [vmem:[#allocation6 + $0x10] ss:$8 sps:$4 sm:$0xff]  }
0x1820   :  { %2564 = vmatpush1.bf16.msra.mxu0 %v3637_v4  ;;  %v3674_v4 = vld [vmem:[#allocation6 + $0x4] ss:$8 sps:$4 sm:$0xff]  }
0x1821   :  { %2565 = vmatprep.subr.bf16.mxu0 %v3642_v61  ;;  %v3672_v61 = vld [vmem:[#allocation6] ss:$8 sps:$4 sm:$0xff]  }
0x1824   :  { %2566 = vmatpush1.bf16.msra.mxu0 %v3640_v5 }
0x1825   :  { %2839 = vmatprep.subr.bf16.mxu0 %v3653_v46 }
0x18c7   :  { %v2363_v40 = vpop.f32.mrf.mxu0 }
0x18c9   :  { %v3465_v41 = vpop.f32.mrf.mxu0 }
0x18cb   :  { %v2366_v42 = vpop.f32.mrf.mxu0 }
0x18cc   :  { %v2370_v43 = vpack.c.bf16 %v2366_v42, %v2363_v40 }
0x18cd   :  { %v3466_v44 = vpop.f32.mrf.mxu0 }
0x18ce   :  { %3472 = vmatmul.mubr.msk.bf16.vlgmr.msra.gmra.mxu1 %vm367_vm1, %v2370_v43  ;;  %v3651_v44 = vld [vmem:[#allocation6 + $0x70] ss:$8 sps:$4 sm:$0xff]  }
0x18cf   :  { %3491 = vmatprep.mubr.msk.bf16.mxu1 %vm3848_vm0, %v3846_v0  ;;  %3476 = vmatpush3.bf16.msra.mxu1 %v3643_v20 }
0x18d0   :  { %3477 = vmatprep.subr.bf16.mxu1 %v3846_v0 }
0x18d3   :  { %3478 = vmatpush3.bf16.msra.mxu1 %v3644_v21 }
0x18d4   :  { %3479 = vmatprep.subr.bf16.mxu1 %v3846_v0 }
0x18d7   :  { %3480 = vmatpush3.bf16.msra.mxu1 %v3645_v22 }
0x18d8   :  { %3481 = vmatprep.subr.bf16.mxu1 %v3846_v0 }
0x18db   :  { %3482 = vmatpush3.bf16.msra.mxu1 %v3646_v23 }
0x18dc   :  { %3483 = vmatprep.subr.bf16.mxu1 %v3846_v0 }
0x18df   :  { %3484 = vmatpush3.bf16.msra.mxu1 %v3647_v24 }
0x18e0   :  { %3485 = vmatprep.subr.bf16.mxu1 %v3846_v0 }
0x198e   :  { %v2420_v47 = vpop.f32.mrf.mxu1 }
0x198f   :  { %v4475_v49 = vadd.f32 %v2420_v47, %v2241_v45  ;;  %v3649_v45 = vld [vmem:[#allocation4 + $0x48] sm:$0xff]  }
0x1990   :  { %v3473_v60 = vpop.f32.mrf.mxu1 }
0x1991   :  { %v2431_v50 = vmul.f32 %v4475_v49, %v4475_v49 }
0x1992   :  { %v2423_v51 = vpop.f32.mrf.mxu1 }
0x1993   :  { %v4479_v48 = vadd.f32 %v2423_v51, %v2242_v28  ;;  %2433 = vadd.xlane.f32.xlu0 %v2431_v50 }
0x1994   :  { %v3474_v53 = vpop.f32.mrf.mxu1 }
0x1995   :  { %v2432_v56 = vmul.f32 %v4479_v48, %v4479_v48 }
0x1997   :  { %2435 = vadd.xlane.f32.xlu0 %v2432_v56 }
0x1a1c   :  { %v2434_v6 = vpop.xlane.xlu0 %2433 }
0x1a1d   :  { %v2437_v7 = vmul.f32 0.0078125, %v2434_v6 }
0x1a1f   :  { %v2439_v8 = vadd.f32 1e-05, %v2437_v7 }
0x1a20   :  { %v2436_v9 = vpop.xlane.xlu0 %2435 }
0x1a21   :  { %3759 = vrsqrt.f32 %v2439_v8  ;;  %v2438_v10 = vmul.f32 0.0078125, %v2436_v9 }
0x1a23   :  { %v2440_v11 = vadd.f32 1e-05, %v2438_v10 }
0x1a25   :  { %3761 = vrsqrt.f32 %v2440_v11 }
0x1a2e   :  { %v3760_v12 = vpop.eup %3759 }
0x1a2f   :  { %v2443_v13 = vmul.f32 %v3760_v12, %v4475_v49 }
0x1a31   :  { %v2451_v17 = vmul.f32 %v3103_v15, %v2443_v13 }
0x1a32   :  { %v3762_v14 = vpop.eup %3761 }
0x1a33   :  { %v2444_v16 = vmul.f32 %v3762_v14, %v4479_v48  ;;  %v3146_v14 = vld [vmem:[%s4557_s8] ss:$0 sm:$0xff] }
0x1a35   :  { %v2452_v18 = vmul.f32 %v3103_v15, %v2444_v16 }
0x1a37   :  { %v2453_v19 = vpack.c.bf16 %v2452_v18, %v2451_v17 }
0x1a39   :  { %2584 = vmatmul.mubr.bf16.vlgmr.msra.gmra.mxu0 %v2453_v19 }
0x1a3a   :  { %2871 = vmatprep.mubr.bf16.mxu0 %v3847_v26  ;;  %v3648_v26 = vld [vmem:[#allocation4 + $0x50] sm:$0xff]   ;;  %2840 = vmatpush1.bf16.msra.mxu0 %v3651_v44 }
0x1a3b   :  { %3486 = vmatpush3.bf16.msra.mxu1 %v3648_v26  ;;  %2841 = vmatprep.subr.bf16.mxu0 %v3656_v57  ;;  %v2888_v26 = vlaneseq }
0x1a3c   :  { %3487 = vmatprep.subr.bf16.mxu1 %v3846_v0 }
0x1a3e   :  { %2842 = vmatpush1.bf16.msra.mxu0 %v3654_v59 }
0x1a3f   :  { %3488 = vmatpush3.bf16.msra.mxu1 %v3649_v45  ;;  %2843 = vmatprep.subr.bf16.mxu0 %v3659_v52  ;;  %v2889_v45 = vand.u32 127, %v2888_v26 }
0x1a40   :  { %3489 = vmatprep.subr.bf16.mxu1 %v3846_v0 }
0x1a42   :  { %2844 = vmatpush1.bf16.msra.mxu0 %v3657_v1 }
0x1a43   :  { %3490 = vmatpush3.bf16.msra.mxu1 %v3650_v25  ;;  %2845 = vmatprep.subr.bf16.mxu0 %v3662_v35  ;;  %v2890_v25 = vadd.s32 128, %v2889_v45 }
0x1a46   :  { %2846 = vmatpush1.bf16.msra.mxu0 %v3660_v62 }
0x1af9   :  { %v2585_v27 = vpop.f32.mrf.mxu0 }
0x1afa   :  { %v3136_v28 = vmul.f32 -1.442695, %v2585_v27 }
0x1afb   :  { %v2587_v29 = vpop.f32.mrf.mxu0 }
0x1afc   :  { %3763 = vpow2.f32 %v3136_v28 }
0x1afd   :  { %v2589_v30 = vpop.f32.mrf.mxu0 }
0x1afe   :  { %v3137_v31 = vmul.f32 -1.442695, %v2589_v30 }
0x1aff   :  { %v2591_v0 = vpop.f32.mrf.mxu0 }
0x1b00   :  { %3765 = vpow2.f32 %v3137_v31 }
0x1b09   :  { %v3764_v32 = vpop.eup %3763 }
0x1b0a   :  { %v2600_v33 = vadd.f32 1.0, %v3764_v32 }
0x1b0c   :  { %3767 = vrcp.f32 %v2600_v33 }
0x1b0d   :  { %v3766_v34 = vpop.eup %3765 }
0x1b0e   :  { %v2601_v36 = vadd.f32 1.0, %v3766_v34 }
0x1b10   :  { %3769 = vrcp.f32 %v2601_v36 }
0x1b19   :  { %v3768_v38 = vpop.eup %3767 }
0x1b1a   :  { %v2606_v54 = vmul.f32 %v3768_v38, %v2585_v27 }
0x1b1c   :  { %v2608_v41 = vmul.f32 %v2606_v54, %v2587_v29 }
0x1b1d   :  { %v3770_v39 = vpop.eup %3769 }
0x1b1e   :  { %v2607_v40 = vmul.f32 %v3770_v39, %v2589_v30 }
0x1b20   :  { %v2609_v42 = vmul.f32 %v2607_v40, %v2591_v0 }
0x1b22   :  { %v2610_v43 = vpack.c.bf16 %v2609_v42, %v2608_v41 }
0x1b24   :  { %3492 = vmatmul.mubr.bf16.vlgmr.msra.gmra.mxu1 %v2610_v43 }
0x1be4   :  { %v2710_v55 = vpop.f32.mrf.mxu1 }
0x1be5   :  { %v2717_v47 = vadd.f32 %v2710_v55, %v4475_v49  ;;  %v3665_v49 = vld [vmem:[#allocation6 + $0x34] ss:$8 sps:$4 sm:$0xff]  }
0x1be6   :  { %v3493_v60 = vpop.f32.mrf.mxu1  ;;  %2847 = vmatprep.subr.bf16.mxu0 %v3665_v49 }
0x1be7   :  { %v2720_v50 = vmul.f32 %v2717_v47, %v2717_v47  ;;  %2848 = vmatpush1.bf16.msra.mxu0 %v3663_v37 }
0x1be8   :  { %v2713_v51 = vpop.f32.mrf.mxu1 }
0x1be9   :  { %v2718_v53 = vadd.f32 %v2713_v51, %v4479_v48  ;;  %2722 = vadd.xlane.f32.xlu0 %v2720_v50  ;;  %v3668_v48 = vld [vmem:[#allocation6 + $0x24] ss:$8 sps:$4 sm:$0xff]  }
0x1bea   :  { %v3494_v56 = vpop.f32.mrf.mxu1  ;;  %2849 = vmatprep.subr.bf16.mxu0 %v3668_v48 }
0x1beb   :  { %v2721_v2 = vmul.f32 %v2718_v53, %v2718_v53  ;;  %2850 = vmatpush1.bf16.msra.mxu0 %v3666_v63 }
0x1bec   :  { %2851 = vmatprep.subr.bf16.mxu0 %v3671_v3 }
0x1bed   :  { %2724 = vadd.xlane.f32.xlu0 %v2721_v2 }
0x1bef   :  { %2852 = vmatpush1.bf16.msra.mxu0 %v3669_v58 }
0x1bf0   :  { %2853 = vmatprep.subr.bf16.mxu0 %v3674_v4 }
0x1bf3   :  { %2854 = vmatpush1.bf16.msra.mxu0 %v3672_v61 }
0x1c72   :  { %v2723_v5 = vpop.xlane.xlu0 %2722 }
0x1c73   :  { %v2726_v6 = vmul.f32 0.0078125, %v2723_v5 }
0x1c75   :  { %v2728_v7 = vadd.f32 1e-05, %v2726_v6 }
0x1c76   :  { %v2725_v8 = vpop.xlane.xlu0 %2724 }
0x1c77   :  { %3771 = vrsqrt.f32 %v2728_v7  ;;  %v2727_v9 = vmul.f32 0.0078125, %v2725_v8 }
0x1c79   :  { %v2729_v10 = vadd.f32 1e-05, %v2727_v9 }
0x1c7b   :  { %3773 = vrsqrt.f32 %v2729_v10 }
0x1c84   :  { %v3772_v11 = vpop.eup %3771 }
0x1c85   :  { %v2732_v12 = vmul.f32 %v3772_v11, %v2717_v47 }
0x1c87   :  { %v2740_v16 = vmul.f32 %v3146_v14, %v2732_v12 }
0x1c88   :  { %v3774_v13 = vpop.eup %3773 }
0x1c89   :  { %v2733_v15 = vmul.f32 %v3774_v13, %v2718_v53 }
0x1c8b   :  { %v2741_v17 = vmul.f32 %v3146_v14, %v2733_v15 }
0x1c8d   :  { %v2742_v18 = vpack.c.bf16 %v2741_v17, %v2740_v16 }
0x1c8f   :  { %2872 = vmatmul.mubr.bf16.vlgmr.msra.gmra.mxu0 %v2742_v18 }
0x1d4f   :  { %v2873_v19 = vpop.f32.mrf.mxu0 }
0x1d51   :  { %v2875_v20 = vpop.f32.mrf.mxu0 }
0x1d52   :  { %v2882_v21 = vmax.f32 %v2873_v19, %v2875_v20 }
0x1d53   :  { %v2877_v22 = vpop.f32.mrf.mxu0 }
0x1d54   :  { %2883 = vmax.xlane.f32.xlu1 %v2882_v21 }
0x1d55   :  { %v2879_v23 = vpop.f32.mrf.mxu0 }
0x1d56   :  { %v2885_v24 = vmax.f32 %v2877_v22, %v2879_v23 }
0x1d58   :  { %2886 = vmax.xlane.f32.xlu0 %v2885_v24 }
0x1ddd   :  { %v2884_v27 = vpop.xlane.xlu1 %2883 }
0x1dde   :  { %vm2891_vm3 = vcmp.eq.f32.partialorder %v2873_v19, %v2884_v27  ;;  %vm2892_vm4 = vcmp.eq.f32.partialorder %v2875_v20, %v2884_v27 }
0x1ddf   :  { %v2895_v28 = vsel %vm2891_vm3, %v2889_v45, 256  ;;  %v2896_v29 = vsel %vm2892_vm4, %v2890_v25, 256 }
0x1de0   :  { %vm2899_vm5 = vcmp.lt.s32.totalorder %v2895_v28, %v2896_v29 }
0x1de1   :  { %v2887_v30 = vpop.xlane.xlu0 %2886  ;;  %v2900_v31 = vsel %vm2899_vm5, %v2895_v28, %v2896_v29 }
0x1de2   :  { %vm2893_vm6 = vcmp.eq.f32.partialorder %v2877_v22, %v2887_v30  ;;  %vm2894_vm7 = vcmp.eq.f32.partialorder %v2879_v23, %v2887_v30  ;;  %v2902_v32 = vshra.s32 %v2900_v31, 16  ;;  %v2901_v40 = vand.u32 65535, %v2900_v31 }
0x1de3   :  { %v2897_v33 = vsel %vm2893_vm6, %v2889_v45, 256  ;;  %v2898_v34 = vsel %vm2894_vm7, %v2890_v25, 256 }
0x1de4   :  { %vm2915_vm8 = vcmp.lt.s32.totalorder %v2897_v33, %v2898_v34  ;;  %v2904_v36 = vcvt.s32.f32 %v2902_v32  ;;  %v2903_v41 = vcvt.s32.f32 %v2901_v40 }
0x1de5   :  { %v2916_v38 = vsel %vm2915_vm8, %v2897_v33, %v2898_v34 }
0x1de6   :  { %2905 = vmin.xlane.f32.xlu0 %v2904_v36  ;;  %v2918_v54 = vshra.s32 %v2916_v38, 16  ;;  %v2917_v42 = vand.u32 65535, %v2916_v38 }
0x1de8   :  { %v2920_v39 = vcvt.s32.f32 %v2918_v54  ;;  %v2919_v46 = vcvt.s32.f32 %v2917_v42 }
0x1dea   :  { %2921 = vmin.xlane.f32.xlu0 %v2920_v39 }
0x1e6f   :  { %v2906_v0 = vpop.xlane.xlu0 %2905 }
0x1e70   :  { %vm2907_vm9 = vcmp.eq.f32.partialorder %v2904_v36, %v2906_v0  ;;  %v2912_v47 = vcvt.f32.s32 %v2906_v0 }
0x1e71   :  { %v2908_v43 = vsel %vm2907_vm9, %v2903_v41, inf }
0x1e72   :  { %2909 = vmin.xlane.f32.xlu0 %v2908_v43  ;;  %v2913_v50 = vshll.u32 %v2912_v47, 16 }
0x1e73   :  { %v2922_v44 = vpop.xlane.xlu0 %2921 }
0x1e74   :  { %vm2923_vm10 = vcmp.eq.f32.partialorder %v2920_v39, %v2922_v44  ;;  %v2928_v51 = vcvt.f32.s32 %v2922_v44 }
0x1e75   :  { %v2924_v55 = vsel %vm2923_vm10, %v2919_v46, inf }
0x1e76   :  { %2925 = vmin.xlane.f32.xlu0 %v2924_v55  ;;  %v2929_v57 = vshll.u32 %v2928_v51, 16 }
0x1efb   :  { %v2910_v60 = vpop.xlane.xlu0 %2909 }
0x1efc   :  { %v2911_v53 = vcvt.f32.s32 %v2910_v60 }
0x1efe   :  { %v2914_v56 = vadd.s32 %v2913_v50, %v2911_v53 }
0x1eff   :  { %v2926_v2 = vpop.xlane.xlu0 %2925 }
0x1f00   :  { %2932 = vst.msk [vmem:[%s4559_s10] sm:$0xff] %vm2931_vm11, %v2914_v56  ;;  %v2927_v59 = vcvt.f32.s32 %v2926_v2 }
0x1f02   :  { %v2930_v52 = vadd.s32 %v2929_v57, %v2927_v59 }
0x1f04   :  { %2933 = vst.msk [vmem:[%s4559_s10 + $0x8] sm:$0xff] %vm2931_vm11, %v2930_v52 }
0x1f05   :  { %2938 = vsyncpa [#allocation3], 1 }
0x1f06   :  { %2939 = vsyncpa [#allocation5], 1 }

</bundles_post_ra>
